<compile_context>
chip_gen: v7x
topology: tpu7x:2x2x1
jax: 0.10.0
libtpu: 0.0.40
codegen_flags: <defaults>
</compile_context>

<pallas_src>
import functools
import math

import jax
import jax.numpy as jnp
from jax.experimental import pallas as pl
from jax.experimental.pallas import tpu as pltpu


# ---------------------------------------------------------------------------
# Pallas kernel: bilinear warp of one batch element (shift-and-select, VPU only).
# x_ref:    (1, C, H, W)      input image
# flow_ref: (1, 2, H, W)      flow (channel 0 = x/width offset, 1 = y/height offset)
# o_ref:    (1, C, H, W)      warped output
# xpad_ref: (C, H+2R, W) f32  scratch: zero-row-padded copy of the image
# ---------------------------------------------------------------------------
def _warp_kernel(x_ref, flow_ref, o_ref, xpad_ref, *, H, W, R):
    C = x_ref.shape[1]

    # Zero-row-padded image: rows [R, R+H) hold the data, border rows stay zero so
    # out-of-bounds *rows* automatically contribute zero (warp zero-padding).
    xpad_ref[...] = jnp.zeros_like(xpad_ref)
    xpad_ref[:, R:R + H, :] = x_ref[0].astype(jnp.float32)

    fx = flow_ref[0, 0].astype(jnp.float32)          # (H, W) flow along width  (x)
    fy = flow_ref[0, 1].astype(jnp.float32)          # (H, W) flow along height (y)

    x0f = jnp.floor(fx)
    y0f = jnp.floor(fy)
    dx0 = x0f.astype(jnp.int32)                      # left  tap column offset
    dy0 = y0f.astype(jnp.int32)                      # upper tap row    offset
    wx1 = fx - x0f
    wx0 = 1.0 - wx1
    wy1 = fy - y0f
    wy0 = 1.0 - wy1

    col = jax.lax.broadcasted_iota(jnp.int32, (H, W), 1)

    # Per-column-offset weights, masked where the source column j+dx is out of bounds
    # (this implements the warp zero-padding for OOB *columns*).
    cxs = []
    for dx in range(-R, R + 1):
        cx = (jnp.where(dx0 == dx, wx0, 0.0)
              + jnp.where(dx0 + 1 == dx, wx1, 0.0))
        cx = jnp.where((col + dx >= 0) & (col + dx < W), cx, 0.0)
        cxs.append(cx)

    acc = jnp.zeros((C, H, W), jnp.float32)
    for dy in range(-R, R + 1):
        ry = (jnp.where(dy0 == dy, wy0, 0.0)
              + jnp.where(dy0 + 1 == dy, wy1, 0.0))            # (H, W)
        rows = xpad_ref[:, R + dy:R + dy + H, :]                # (C, H, W) row-shifted
        for k, dx in enumerate(range(-R, R + 1)):
            wmap = ry * cxs[k]                                  # (H, W) bilinear weight
            if dx == 0:
                shifted = rows
            else:
                # shifted[c, i, j] = rows[c, i, j + dx]; wrapped columns carry zero
                # weight via the mask baked into cxs[k].
                shifted = pltpu.roll(rows, (-dx) % W, axis=2)
            acc = acc + shifted * wmap                          # broadcast over C
    o_ref[0] = acc.astype(o_ref.dtype)


def warp_pallas(x, flow, *, max_abs_flow=1.0):
    """x: (B, C, H, W) f32, flow: (B, 2, H, W) f32 (pixel offsets, |flow|<=max_abs_flow)."""
    B, C, H, W = x.shape
    assert flow.shape == (B, 2, H, W)
    R = max(1, int(math.ceil(float(max_abs_flow))))   # tap radius; 1 for prob <= 1

    kernel = functools.partial(_warp_kernel, H=H, W=W, R=R)
    return pl.pallas_call(
        kernel,
        out_shape=jax.ShapeDtypeStruct((B, C, H, W), x.dtype),
        grid_spec=pltpu.PrefetchScalarGridSpec(
            num_scalar_prefetch=0,
            grid=(B,),
            in_specs=[
                pl.BlockSpec((1, C, H, W), lambda b: (b, 0, 0, 0)),
                pl.BlockSpec((1, 2, H, W), lambda b: (b, 0, 0, 0)),
            ],
            out_specs=pl.BlockSpec((1, C, H, W), lambda b: (b, 0, 0, 0)),
            scratch_shapes=[pltpu.VMEM((C, H + 2 * R, W), jnp.float32)],
        ),
        compiler_params=pltpu.CompilerParams(
            dimension_semantics=("parallel",),
            vmem_limit_bytes=32 * 1024 * 1024,
        ),
    )(x, flow)


# ---------------------------------------------------------------------------
# Jitter forward: random block-constant flow + warp (flow generation is glue,
# mirroring torch.rand + F.interpolate(mode='nearest') in the original module).
# ---------------------------------------------------------------------------
def jitter_forward(x, key, *, H, W, blockSize, prob=1.0):
    B = x.shape[0]
    rf = jax.random.uniform(
        key, (B, 2, H // blockSize, W // blockSize), dtype=jnp.float32) * 2.0 - 1.0
    rf = rf * prob
    # F.interpolate(..., mode='nearest') from (H/bs, W/bs) to (H, W) == block repeat.
    rf = jnp.repeat(jnp.repeat(rf, blockSize, axis=2), blockSize, axis=3)
    return warp_pallas(x, rf, max_abs_flow=prob), rf


# ---------------------------------------------------------------------------
# Pure-JAX reference (same warp semantics) for a correctness check.
# ---------------------------------------------------------------------------
def warp_ref(x, flow):
    B, C, H, W = x.shape
    jj = jnp.arange(W, dtype=jnp.float32)[None, :]
    ii = jnp.arange(H, dtype=jnp.float32)[:, None]
    sx = jj + flow[:, 0]                 # (B, H, W)
    sy = ii + flow[:, 1]
    x0f = jnp.floor(sx)
    y0f = jnp.floor(sy)
    x0 = x0f.astype(jnp.int32); x1 = x0 + 1
    y0 = y0f.astype(jnp.int32); y1 = y0 + 1
    wx1 = sx - x0f; wx0 = 1.0 - wx1
    wy1 = sy - y0f; wy0 = 1.0 - wy1

    bidx = jnp.arange(B)[:, None, None, None]
    cidx = jnp.arange(C)[None, :, None, None]

    def tap(xi, yi, w):
        valid = (xi >= 0) & (xi < W) & (yi >= 0) & (yi < H)
        xc = jnp.clip(xi, 0, W - 1)
        yc = jnp.clip(yi, 0, H - 1)
        g = x[bidx, cidx, yc[:, None], xc[:, None]]          # (B, C, H, W)
        return g * (w * valid)[:, None]

    return (tap(x0, y0, wy0 * wx0) + tap(x1, y0, wy0 * wx1)
            + tap(x0, y1, wy1 * wx0) + tap(x1, y1, wy1 * wx1))


if __name__ == "__main__":
    # Small shapes consistent with the module (H=W, divisible by blockSize).
    B, C, H, W = 2, 4, 16, 16
    blockSize = 4
    prob = 1.0

    key = jax.random.PRNGKey(0)
    kx, kflow = jax.random.split(key)
    x = jax.random.uniform(kx, (B, C, H, W), dtype=jnp.float32)

    out, flow = jitter_forward(x, kflow, H=H, W=W, blockSize=blockSize, prob=prob)
    out = jax.block_until_ready(out)

    ref = warp_ref(x, flow)
    assert out.shape == (B, C, H, W)
    err = float(jnp.max(jnp.abs(out - ref)))
    assert err < 1e-3, f"Pallas warp mismatch vs reference: {err}"

    print("KERNEL_OK")
</pallas_src>

<mosaic_0001>
module attributes {stable_mosaic.version = 11 : i64} {
  func.func @_warp_kernel(%arg0: i32, %arg1: memref<1x4x16x16xf32, #tpu.memory_space<vmem>>, %arg2: memref<1x2x16x16xf32, #tpu.memory_space<vmem>>, %arg3: memref<1x4x16x16xf32, #tpu.memory_space<vmem>>, %arg4: memref<4x18x16xf32, #tpu.memory_space<vmem>>) attributes {dimension_semantics = [#tpu.dimension_semantics<parallel>], iteration_bounds = array<i64: 2>, scalar_prefetch = 0 : i64, scratch_operands = 1 : i64, tpu.core_type = #tpu.core_type<tc>, window_params = [{transform_indices = @transform_0, window_bounds = array<i64: 1, 4, 16, 16>}, {transform_indices = @transform_1, window_bounds = array<i64: 1, 2, 16, 16>}, {transform_indices = @transform_2, window_bounds = array<i64: 1, 4, 16, 16>}]} {
    %cst = arith.constant 0.000000e+00 : f32
    %0 = vector.broadcast %cst : f32 to vector<4x18x16xf32>
    %c0 = arith.constant 0 : index
    %c0_0 = arith.constant 0 : index
    %c0_1 = arith.constant 0 : index
    %1 = vector.load %arg4[%c0, %c0_0, %c0_1] : memref<4x18x16xf32, #tpu.memory_space<vmem>>, vector<4x18x16xf32>
    tpu.vector_store %arg4[%c0, %c0_0, %c0_1], %0 {strides = array<i32>} : memref<4x18x16xf32, #tpu.memory_space<vmem>>, vector<4x18x16xf32>,
    %c0_2 = arith.constant 0 : index
    %c0_3 = arith.constant 0 : index
    %c0_4 = arith.constant 0 : index
    %c0_5 = arith.constant 0 : index
    %2 = vector.load %arg1[%c0_2, %c0_3, %c0_4, %c0_5] : memref<1x4x16x16xf32, #tpu.memory_space<vmem>>, vector<1x4x16x16xf32>
    %3 = vector.shape_cast %2 : vector<1x4x16x16xf32> to vector<4x16x16xf32>
    %c0_6 = arith.constant 0 : index
    %c1 = arith.constant 1 : index
    %c0_7 = arith.constant 0 : index
    %4 = vector.load %arg4[%c0_6, %c1, %c0_7] : memref<4x18x16xf32, #tpu.memory_space<vmem>>, vector<4x16x16xf32>
    tpu.vector_store %arg4[%c0_6, %c1, %c0_7], %3 {strides = array<i32>} : memref<4x18x16xf32, #tpu.memory_space<vmem>>, vector<4x16x16xf32>,
    %c0_8 = arith.constant 0 : index
    %c0_9 = arith.constant 0 : index
    %c0_10 = arith.constant 0 : index
    %c0_11 = arith.constant 0 : index
    %5 = vector.load %arg2[%c0_8, %c0_9, %c0_10, %c0_11] : memref<1x2x16x16xf32, #tpu.memory_space<vmem>>, vector<1x1x16x16xf32>
    %6 = vector.shape_cast %5 : vector<1x1x16x16xf32> to vector<16x16xf32>
    %c0_12 = arith.constant 0 : index
    %c1_13 = arith.constant 1 : index
    %c0_14 = arith.constant 0 : index
    %c0_15 = arith.constant 0 : index
    %7 = vector.load %arg2[%c0_12, %c1_13, %c0_14, %c0_15] : memref<1x2x16x16xf32, #tpu.memory_space<vmem>>, vector<1x1x16x16xf32>
    %8 = vector.shape_cast %7 : vector<1x1x16x16xf32> to vector<16x16xf32>
    %9 = math.floor %6 : vector<16x16xf32>
    %10 = math.floor %8 : vector<16x16xf32>
    %11 = arith.fptosi %9 : vector<16x16xf32> to vector<16x16xi32>
    %12 = arith.fptosi %10 : vector<16x16xf32> to vector<16x16xi32>
    %13 = arith.subf %6, %9 : vector<16x16xf32>
    %cst_16 = arith.constant 1.000000e+00 : f32
    %14 = vector.broadcast %cst_16 : f32 to vector<16x16xf32>
    %15 = arith.subf %14, %13 : vector<16x16xf32>
    %16 = arith.subf %8, %10 : vector<16x16xf32>
    %cst_17 = arith.constant 1.000000e+00 : f32
    %17 = vector.broadcast %cst_17 : f32 to vector<16x16xf32>
    %18 = arith.subf %17, %16 : vector<16x16xf32>
    %19 = tpu.iota {dimensions = array<i32: 1>} : vector<16x16xi32>
    %c-1_i32 = arith.constant -1 : i32
    %20 = vector.broadcast %c-1_i32 : i32 to vector<16x16xi32>
    %21 = arith.cmpi eq, %11, %20 : vector<16x16xi32>
    %cst_18 = arith.constant 0.000000e+00 : f32
    %22 = vector.broadcast %cst_18 : f32 to vector<16x16xf32>
    %23 = arith.select %21, %15, %22 : vector<16x16xi1>, vector<16x16xf32>
    %c1_i32 = arith.constant 1 : i32
    %24 = vector.broadcast %c1_i32 : i32 to vector<16x16xi32>
    %25 = arith.addi %11, %24 : vector<16x16xi32>
    %c-1_i32_19 = arith.constant -1 : i32
    %26 = vector.broadcast %c-1_i32_19 : i32 to vector<16x16xi32>
    %27 = arith.cmpi eq, %25, %26 : vector<16x16xi32>
    %cst_20 = arith.constant 0.000000e+00 : f32
    %28 = vector.broadcast %cst_20 : f32 to vector<16x16xf32>
    %29 = arith.select %27, %13, %28 : vector<16x16xi1>, vector<16x16xf32>
    %30 = arith.addf %23, %29 : vector<16x16xf32>
    %c-1_i32_21 = arith.constant -1 : i32
    %31 = vector.broadcast %c-1_i32_21 : i32 to vector<16x16xi32>
    %32 = arith.addi %19, %31 : vector<16x16xi32>
    %c0_i32 = arith.constant 0 : i32
    %33 = vector.broadcast %c0_i32 : i32 to vector<16x16xi32>
    %34 = arith.cmpi sge, %32, %33 : vector<16x16xi32>
    %c-1_i32_22 = arith.constant -1 : i32
    %35 = vector.broadcast %c-1_i32_22 : i32 to vector<16x16xi32>
    %36 = arith.addi %19, %35 : vector<16x16xi32>
    %c16_i32 = arith.constant 16 : i32
    %37 = vector.broadcast %c16_i32 : i32 to vector<16x16xi32>
    %38 = arith.cmpi slt, %36, %37 : vector<16x16xi32>
    %39 = arith.andi %34, %38 : vector<16x16xi1>
    %cst_23 = arith.constant 0.000000e+00 : f32
    %40 = vector.broadcast %cst_23 : f32 to vector<16x16xf32>
    %41 = arith.select %39, %30, %40 : vector<16x16xi1>, vector<16x16xf32>
    %c0_i32_24 = arith.constant 0 : i32
    %42 = vector.broadcast %c0_i32_24 : i32 to vector<16x16xi32>
    %43 = arith.cmpi eq, %11, %42 : vector<16x16xi32>
    %cst_25 = arith.constant 0.000000e+00 : f32
    %44 = vector.broadcast %cst_25 : f32 to vector<16x16xf32>
    %45 = arith.select %43, %15, %44 : vector<16x16xi1>, vector<16x16xf32>
    %c1_i32_26 = arith.constant 1 : i32
    %46 = vector.broadcast %c1_i32_26 : i32 to vector<16x16xi32>
    %47 = arith.addi %11, %46 : vector<16x16xi32>
    %c0_i32_27 = arith.constant 0 : i32
    %48 = vector.broadcast %c0_i32_27 : i32 to vector<16x16xi32>
    %49 = arith.cmpi eq, %47, %48 : vector<16x16xi32>
    %cst_28 = arith.constant 0.000000e+00 : f32
    %50 = vector.broadcast %cst_28 : f32 to vector<16x16xf32>
    %51 = arith.select %49, %13, %50 : vector<16x16xi1>, vector<16x16xf32>
    %52 = arith.addf %45, %51 : vector<16x16xf32>
    %c0_i32_29 = arith.constant 0 : i32
    %53 = vector.broadcast %c0_i32_29 : i32 to vector<16x16xi32>
    %54 = arith.addi %19, %53 : vector<16x16xi32>
    %c0_i32_30 = arith.constant 0 : i32
    %55 = vector.broadcast %c0_i32_30 : i32 to vector<16x16xi32>
    %56 = arith.cmpi sge, %54, %55 : vector<16x16xi32>
    %c0_i32_31 = arith.constant 0 : i32
    %57 = vector.broadcast %c0_i32_31 : i32 to vector<16x16xi32>
    %58 = arith.addi %19, %57 : vector<16x16xi32>
    %c16_i32_32 = arith.constant 16 : i32
    %59 = vector.broadcast %c16_i32_32 : i32 to vector<16x16xi32>
    %60 = arith.cmpi slt, %58, %59 : vector<16x16xi32>
    %61 = arith.andi %56, %60 : vector<16x16xi1>
    %cst_33 = arith.constant 0.000000e+00 : f32
    %62 = vector.broadcast %cst_33 : f32 to vector<16x16xf32>
    %63 = arith.select %61, %52, %62 : vector<16x16xi1>, vector<16x16xf32>
    %c1_i32_34 = arith.constant 1 : i32
    %64 = vector.broadcast %c1_i32_34 : i32 to vector<16x16xi32>
    %65 = arith.cmpi eq, %11, %64 : vector<16x16xi32>
    %cst_35 = arith.constant 0.000000e+00 : f32
    %66 = vector.broadcast %cst_35 : f32 to vector<16x16xf32>
    %67 = arith.select %65, %15, %66 : vector<16x16xi1>, vector<16x16xf32>
    %c1_i32_36 = arith.constant 1 : i32
    %68 = vector.broadcast %c1_i32_36 : i32 to vector<16x16xi32>
    %69 = arith.addi %11, %68 : vector<16x16xi32>
    %c1_i32_37 = arith.constant 1 : i32
    %70 = vector.broadcast %c1_i32_37 : i32 to vector<16x16xi32>
    %71 = arith.cmpi eq, %69, %70 : vector<16x16xi32>
    %cst_38 = arith.constant 0.000000e+00 : f32
    %72 = vector.broadcast %cst_38 : f32 to vector<16x16xf32>
    %73 = arith.select %71, %13, %72 : vector<16x16xi1>, vector<16x16xf32>
    %74 = arith.addf %67, %73 : vector<16x16xf32>
    %c1_i32_39 = arith.constant 1 : i32
    %75 = vector.broadcast %c1_i32_39 : i32 to vector<16x16xi32>
    %76 = arith.addi %19, %75 : vector<16x16xi32>
    %c0_i32_40 = arith.constant 0 : i32
    %77 = vector.broadcast %c0_i32_40 : i32 to vector<16x16xi32>
    %78 = arith.cmpi sge, %76, %77 : vector<16x16xi32>
    %c1_i32_41 = arith.constant 1 : i32
    %79 = vector.broadcast %c1_i32_41 : i32 to vector<16x16xi32>
    %80 = arith.addi %19, %79 : vector<16x16xi32>
    %c16_i32_42 = arith.constant 16 : i32
    %81 = vector.broadcast %c16_i32_42 : i32 to vector<16x16xi32>
    %82 = arith.cmpi slt, %80, %81 : vector<16x16xi32>
    %83 = arith.andi %78, %82 : vector<16x16xi1>
    %cst_43 = arith.constant 0.000000e+00 : f32
    %84 = vector.broadcast %cst_43 : f32 to vector<16x16xf32>
    %85 = arith.select %83, %74, %84 : vector<16x16xi1>, vector<16x16xf32>
    %cst_44 = arith.constant 0.000000e+00 : f32
    %86 = vector.broadcast %cst_44 : f32 to vector<4x16x16xf32>
    %c-1_i32_45 = arith.constant -1 : i32
    %87 = vector.broadcast %c-1_i32_45 : i32 to vector<16x16xi32>
    %88 = arith.cmpi eq, %12, %87 : vector<16x16xi32>
    %cst_46 = arith.constant 0.000000e+00 : f32
    %89 = vector.broadcast %cst_46 : f32 to vector<16x16xf32>
    %90 = arith.select %88, %18, %89 : vector<16x16xi1>, vector<16x16xf32>
    %c1_i32_47 = arith.constant 1 : i32
    %91 = vector.broadcast %c1_i32_47 : i32 to vector<16x16xi32>
    %92 = arith.addi %12, %91 : vector<16x16xi32>
    %c-1_i32_48 = arith.constant -1 : i32
    %93 = vector.broadcast %c-1_i32_48 : i32 to vector<16x16xi32>
    %94 = arith.cmpi eq, %92, %93 : vector<16x16xi32>
    %cst_49 = arith.constant 0.000000e+00 : f32
    %95 = vector.broadcast %cst_49 : f32 to vector<16x16xf32>
    %96 = arith.select %94, %16, %95 : vector<16x16xi1>, vector<16x16xf32>
    %97 = arith.addf %90, %96 : vector<16x16xf32>
    %c0_50 = arith.constant 0 : index
    %c0_51 = arith.constant 0 : index
    %c0_52 = arith.constant 0 : index
    %98 = vector.load %arg4[%c0_50, %c0_51, %c0_52] : memref<4x18x16xf32, #tpu.memory_space<vmem>>, vector<4x16x16xf32>
    %99 = arith.mulf %97, %41 : vector<16x16xf32>
    %c1_i32_53 = arith.constant 1 : i32
    %100 = tpu.dynamic_rotate %98 by %c1_i32_53 dim 2 : vector<4x16x16xf32>, i32 -> vector<4x16x16xf32>
    %101 = vector.shape_cast %99 : vector<16x16xf32> to vector<1x16x16xf32>
    %102 = vector.broadcast %101 : vector<1x16x16xf32> to vector<4x16x16xf32>
    %103 = arith.mulf %100, %102 : vector<4x16x16xf32>
    %104 = arith.addf %86, %103 : vector<4x16x16xf32>
    %105 = arith.mulf %97, %63 : vector<16x16xf32>
    %106 = vector.shape_cast %105 : vector<16x16xf32> to vector<1x16x16xf32>
    %107 = vector.broadcast %106 : vector<1x16x16xf32> to vector<4x16x16xf32>
    %108 = arith.mulf %98, %107 : vector<4x16x16xf32>
    %109 = arith.addf %104, %108 : vector<4x16x16xf32>
    %110 = arith.mulf %97, %85 : vector<16x16xf32>
    %c15_i32 = arith.constant 15 : i32
    %111 = tpu.dynamic_rotate %98 by %c15_i32 dim 2 : vector<4x16x16xf32>, i32 -> vector<4x16x16xf32>
    %112 = vector.shape_cast %110 : vector<16x16xf32> to vector<1x16x16xf32>
    %113 = vector.broadcast %112 : vector<1x16x16xf32> to vector<4x16x16xf32>
    %114 = arith.mulf %111, %113 : vector<4x16x16xf32>
    %115 = arith.addf %109, %114 : vector<4x16x16xf32>
    %c0_i32_54 = arith.constant 0 : i32
    %116 = vector.broadcast %c0_i32_54 : i32 to vector<16x16xi32>
    %117 = arith.cmpi eq, %12, %116 : vector<16x16xi32>
    %cst_55 = arith.constant 0.000000e+00 : f32
    %118 = vector.broadcast %cst_55 : f32 to vector<16x16xf32>
    %119 = arith.select %117, %18, %118 : vector<16x16xi1>, vector<16x16xf32>
    %c1_i32_56 = arith.constant 1 : i32
    %120 = vector.broadcast %c1_i32_56 : i32 to vector<16x16xi32>
    %121 = arith.addi %12, %120 : vector<16x16xi32>
    %c0_i32_57 = arith.constant 0 : i32
    %122 = vector.broadcast %c0_i32_57 : i32 to vector<16x16xi32>
    %123 = arith.cmpi eq, %121, %122 : vector<16x16xi32>
    %cst_58 = arith.constant 0.000000e+00 : f32
    %124 = vector.broadcast %cst_58 : f32 to vector<16x16xf32>
    %125 = arith.select %123, %16, %124 : vector<16x16xi1>, vector<16x16xf32>
    %126 = arith.addf %119, %125 : vector<16x16xf32>
    %c0_59 = arith.constant 0 : index
    %c1_60 = arith.constant 1 : index
    %c0_61 = arith.constant 0 : index
    %127 = vector.load %arg4[%c0_59, %c1_60, %c0_61] : memref<4x18x16xf32, #tpu.memory_space<vmem>>, vector<4x16x16xf32>
    %128 = arith.mulf %126, %41 : vector<16x16xf32>
    %c1_i32_62 = arith.constant 1 : i32
    %129 = tpu.dynamic_rotate %127 by %c1_i32_62 dim 2 : vector<4x16x16xf32>, i32 -> vector<4x16x16xf32>
    %130 = vector.shape_cast %128 : vector<16x16xf32> to vector<1x16x16xf32>
    %131 = vector.broadcast %130 : vector<1x16x16xf32> to vector<4x16x16xf32>
    %132 = arith.mulf %129, %131 : vector<4x16x16xf32>
    %133 = arith.addf %115, %132 : vector<4x16x16xf32>
    %134 = arith.mulf %126, %63 : vector<16x16xf32>
    %135 = vector.shape_cast %134 : vector<16x16xf32> to vector<1x16x16xf32>
    %136 = vector.broadcast %135 : vector<1x16x16xf32> to vector<4x16x16xf32>
    %137 = arith.mulf %127, %136 : vector<4x16x16xf32>
    %138 = arith.addf %133, %137 : vector<4x16x16xf32>
    %139 = arith.mulf %126, %85 : vector<16x16xf32>
    %c15_i32_63 = arith.constant 15 : i32
    %140 = tpu.dynamic_rotate %127 by %c15_i32_63 dim 2 : vector<4x16x16xf32>, i32 -> vector<4x16x16xf32>
    %141 = vector.shape_cast %139 : vector<16x16xf32> to vector<1x16x16xf32>
    %142 = vector.broadcast %141 : vector<1x16x16xf32> to vector<4x16x16xf32>
    %143 = arith.mulf %140, %142 : vector<4x16x16xf32>
    %144 = arith.addf %138, %143 : vector<4x16x16xf32>
    %c1_i32_64 = arith.constant 1 : i32
    %145 = vector.broadcast %c1_i32_64 : i32 to vector<16x16xi32>
    %146 = arith.cmpi eq, %12, %145 : vector<16x16xi32>
    %cst_65 = arith.constant 0.000000e+00 : f32
    %147 = vector.broadcast %cst_65 : f32 to vector<16x16xf32>
    %148 = arith.select %146, %18, %147 : vector<16x16xi1>, vector<16x16xf32>
    %c1_i32_66 = arith.constant 1 : i32
    %149 = vector.broadcast %c1_i32_66 : i32 to vector<16x16xi32>
    %150 = arith.addi %12, %149 : vector<16x16xi32>
    %c1_i32_67 = arith.constant 1 : i32
    %151 = vector.broadcast %c1_i32_67 : i32 to vector<16x16xi32>
    %152 = arith.cmpi eq, %150, %151 : vector<16x16xi32>
    %cst_68 = arith.constant 0.000000e+00 : f32
    %153 = vector.broadcast %cst_68 : f32 to vector<16x16xf32>
    %154 = arith.select %152, %16, %153 : vector<16x16xi1>, vector<16x16xf32>
    %155 = arith.addf %148, %154 : vector<16x16xf32>
    %c0_69 = arith.constant 0 : index
    %c2 = arith.constant 2 : index
    %c0_70 = arith.constant 0 : index
    %156 = vector.load %arg4[%c0_69, %c2, %c0_70] : memref<4x18x16xf32, #tpu.memory_space<vmem>>, vector<4x16x16xf32>
    %157 = arith.mulf %155, %41 : vector<16x16xf32>
    %c1_i32_71 = arith.constant 1 : i32
    %158 = tpu.dynamic_rotate %156 by %c1_i32_71 dim 2 : vector<4x16x16xf32>, i32 -> vector<4x16x16xf32>
    %159 = vector.shape_cast %157 : vector<16x16xf32> to vector<1x16x16xf32>
    %160 = vector.broadcast %159 : vector<1x16x16xf32> to vector<4x16x16xf32>
    %161 = arith.mulf %158, %160 : vector<4x16x16xf32>
    %162 = arith.addf %144, %161 : vector<4x16x16xf32>
    %163 = arith.mulf %155, %63 : vector<16x16xf32>
    %164 = vector.shape_cast %163 : vector<16x16xf32> to vector<1x16x16xf32>
    %165 = vector.broadcast %164 : vector<1x16x16xf32> to vector<4x16x16xf32>
    %166 = arith.mulf %156, %165 : vector<4x16x16xf32>
    %167 = arith.addf %162, %166 : vector<4x16x16xf32>
    %168 = arith.mulf %155, %85 : vector<16x16xf32>
    %c15_i32_72 = arith.constant 15 : i32
    %169 = tpu.dynamic_rotate %156 by %c15_i32_72 dim 2 : vector<4x16x16xf32>, i32 -> vector<4x16x16xf32>
    %170 = vector.shape_cast %168 : vector<16x16xf32> to vector<1x16x16xf32>
    %171 = vector.broadcast %170 : vector<1x16x16xf32> to vector<4x16x16xf32>
    %172 = arith.mulf %169, %171 : vector<4x16x16xf32>
    %173 = arith.addf %167, %172 : vector<4x16x16xf32>
    %c0_73 = arith.constant 0 : index
    %c0_74 = arith.constant 0 : index
    %c0_75 = arith.constant 0 : index
    %c0_76 = arith.constant 0 : index
    %174 = vector.load %arg3[%c0_73, %c0_74, %c0_75, %c0_76] : memref<1x4x16x16xf32, #tpu.memory_space<vmem>>, vector<1x4x16x16xf32>
    %175 = vector.shape_cast %174 : vector<1x4x16x16xf32> to vector<4x16x16xf32>
    %176 = vector.shape_cast %173 : vector<4x16x16xf32> to vector<1x4x16x16xf32>
    tpu.vector_store %arg3[%c0_73, %c0_74, %c0_75, %c0_76], %176 {strides = array<i32>} : memref<1x4x16x16xf32, #tpu.memory_space<vmem>>, vector<1x4x16x16xf32>,
    return
  }
  func.func @transform_0(%arg0: i32) -> (i32, i32, i32, i32) {
    %c0_i32 = arith.constant 0 : i32
    %c0_i32_0 = arith.constant 0 : i32
    %c0_i32_1 = arith.constant 0 : i32
    %c0_i32_2 = arith.constant 0 : i32
    return %arg0, %c0_i32, %c0_i32_0, %c0_i32_1 : i32, i32, i32, i32
  }
  func.func @transform_1(%arg0: i32) -> (i32, i32, i32, i32) {
    %c0_i32 = arith.constant 0 : i32
    %c0_i32_0 = arith.constant 0 : i32
    %c0_i32_1 = arith.constant 0 : i32
    %c0_i32_2 = arith.constant 0 : i32
    return %arg0, %c0_i32, %c0_i32_0, %c0_i32_1 : i32, i32, i32, i32
  }
  func.func @transform_2(%arg0: i32) -> (i32, i32, i32, i32) {
    %c0_i32 = arith.constant 0 : i32
    %c0_i32_0 = arith.constant 0 : i32
    %c0_i32_1 = arith.constant 0 : i32
    %c0_i32_2 = arith.constant 0 : i32
    return %arg0, %c0_i32, %c0_i32_0, %c0_i32_1 : i32, i32, i32, i32
  }
}

</mosaic_0001>

<bundles_post_ra>
// kernel: tpu_custom_call.1
= control target key start
LH: loop header
LB: loop body
LE: loop exit
PB: predicated region body
PF: predicated region fallthrough
CT: control target
= control target key end

     0   :  { %7 = vsyncpa [#allocation4], 0  ;;  %s2205_s0 = inlined_call_operand.hbm [shape: f32[2,4,16,16], index: 0, kind: input, shape index: {}]   ;;  %s2206_s1 = inlined_call_operand.hbm [shape: f32[2,2,16,16], index: 1, kind: input, shape index: {}]   ;;  %s2207_s2 = inlined_call_operand.hbm [shape: f32[2,4,16,16], index: 2, kind: output, shape index: {}]  }
   0x1   :  { %9 = vsyncpa [#allocation4 + $0x1], 0 }
   0x2   :  { %10 = vsyncpa [#allocation7], 0 }
   0x3   :  { %12 = vsyncpa [#allocation7 + $0x1], 0 }
   0x4   :  { %13 = vsyncpa [#allocation5], 0 }
   0x5   :  { %15 = vsyncpa [#allocation5 + $0x1], 0  ;;  %s1309_s9 = smov 0   ;;  %s1311_s10 = smov 0  }
   0x6   :  { %s1313_s11 = smov 0   ;;  %s1315_s12 = smov 0  }
   0x7 LB: > { %s1330_s13 = sadd.s32 4294967295, %s1279_s12   ;;  %s1057_s14 = sadd.s32 4294967294, %s1279_s12   ;;  %s1279_s12 = sphi %s1315_s12, %s2225_s12   ;;  %s1275_s11 = sphi %s1313_s11, %s2224_s11   ;;  %s1271_s10 = sphi %s1311_s10, %s2223_s10   ;;  %s1267_s9 = sphi %s1309_s9, %s2222_s9  }
   0x8   : > { %s1334_s15 = sadd.s32 1, %s1279_s12   ;;  %s28_s16 = sadd.s32 1, %s1275_s11 }
   0x9   : > { %s25_s17 = ssub.s32 %s1279_s12, %s1334_s15  ;;  %p35_p0 = scmp.ne.s32.totalorder %s1275_s11, %s1271_s10 }
   0xa   : > { %p26_p1 = scmp.eq.s32.totalorder %s25_s17, 0  ;;  %p36_p2 = scmp.eq.s32.totalorder %s1279_s12, 0 }
   0xb   : > { %p41_p3 = scmp.ne.s32.totalorder %s1271_s10, %s1267_s9  ;;  %p42_p4 = scmp.eq.s32.totalorder %s1330_s13, 0 }
   0xc   : > { %s1346_s18 = scalar_select %p26_p1, %s1275_s11, %s28_s16  }
   0xd   : > { %p1348_p5 = por %p36_p2, %p35_p0  ;;  %p1352_p6 = por %p42_p4, %p41_p3 }
   0xe   : > { %p91_p7 = scmp.eq.s32.totalorder %s1330_s13, 1  ;;  %p97_p8 = scmp.eq.s32.totalorder %s1057_s14, 1 }
   0xf   : > { %s2211_s20 = scalar_select %p1352_p6, 1, 0 }
  0x10   : > { %p1105_p10 = scmp.lt.s32.totalorder %s1279_s12, 2  ;;  %p1359_p11 = por %p91_p7, %p35_p0 }
  0x11   : > { %p1363_p12 = por %p97_p8, %p41_p3  ;;  %s1368_s23 = sand.u32 1, %s1275_s11  }
  0x12   : > { %s2212_s21 = scalar_select %p1359_p11, 1, 0 }
  0x13   : > { %s2213_s22 = scalar_select %p1363_p12, 1, 0 }
  0x14   : > { %s1077_s24 = sshll.u32 %s1279_s12, 10  ;;  %s1060_s25 = sshll.u32 %s1368_s23, 6 }
  0x15   : > { %s1375_s28 = scalar_lea.hbm %s2205_s0, %s1077_s24  ;;  %s121_s29 = scalar_lea.vmem [#allocation3], %s1060_s25 }
  0x16   : > { %s128_s30 = sshll.u32 %s121_s29, 4  ;;  %p1379_p13 = pnand %p1105_p10, %p1348_p5  ;;  %s1383_s30 = int_to_ptr.vmem [resolvable:$true] %s128_s30 }
  0x17   : > { %s118_s4 = scalar_lea.sflag [#allocation4], %s1368_s23  ;;  %s1149_s5 = scalar_lea.hbm %s1375_s28, 1024 }
  0x18   : > { %p1150_p0 = scmp.ne.s32.totalorder %s1375_s28, %s1149_s5  ;;  %p1151_p1 = pneg %p1379_p13 }
  0x19   : > { %s1154_s8 = scalar_lea.hbm %s2205_s0, 2048  ;;  %p1155_p4 = scmp.lt.u32.totalorder %s1375_s28, %s2205_s0 }
  0x1a   : > { %p1152_p2 = pnand %p1151_p1, %p1150_p0  ;;  %p1156_p5 = scmp.lt.u32.totalorder %s1154_s8, %s1149_s5 }
  0x1b   : > { %p1158_p8 = scmp.lt.u32.totalorder %s1149_s5, %s1375_s28 }
  0x1c   : > { %p1153_p3 = pneg %p1152_p2  ;;  %p1157_p7 = por %p1156_p5, %p1155_p4 }
  0x1e   : > { %p1159_p10 = por %p1158_p8, %p1157_p7 }
  0x20   : > { %p1160_p9 = pnand %p1159_p10, %p1153_p3 }
  0x22   : > { %1163 = shalt.err (!%p1160_p9)
}
  0x23   : > { %s1164_s17 = scalar_lea.vmem %s1383_s30, 1024  ;;  %s1281_s19 = smov [#allocation3]  }
  0x24   : > { %p1165_p0 = scmp.ne.s32.totalorder %s1383_s30, %s1164_s17  ;;  %s1169_s24 = sshll.u32 %s1281_s19, 4  ;;  %s1170_s24 = int_to_ptr.vmem [resolvable:$false] %s1169_s24 }
  0x25   : > { %s1171_s25 = scalar_lea.vmem %s1170_s24, 2048  ;;  %p1172_p11 = scmp.lt.s32.totalorder %s1383_s30, %s1170_s24 }
  0x26   : > { %p1167_p2 = pnand %p1165_p0, %p1151_p1  ;;  %p1173_p4 = scmp.lt.s32.totalorder %s1171_s25, %s1164_s17 }
  0x28   : > { %p1168_p12 = pneg %p1167_p2  ;;  %p1174_p5 = por %p1173_p4, %p1172_p11 }
  0x2a   : > { %p1175_p7 = pnand %p1174_p5, %p1168_p12 }
  0x2c   : > { %1178 = shalt.err (!%p1175_p7)
}
  0x2d   : > { %s1282_s26 = smov 128   ;;  %s1283_s27 = smov 8  }
  0x2e   : > { %1097 = dma.hbm_to_vmem [thread:$0]  (!%p1379_p13), %s1375_s28, 1024, %s1383_s30, %s118_s4, %s1282_s26, %s1282_s26, %s1283_s27  }
  0x2f   : > { %p1066_p9 = scmp.ge.s32.totalorder %s1279_s12, 1  ;;  %p157_p11 = scmp.lt.s32.totalorder %s1279_s12, 3 }
  0x30   : > { %s1063_s29 = sshll.u32 %s1368_s23, 5  ;;  %s1078_s6 = sshll.u32 %s1279_s12, 9 }
  0x31   : > { %p1419_p12 = pnand %p1066_p9, %p157_p11  ;;  %s142_s7 = scalar_lea.vmem [#allocation6], %s1063_s29 }
  0x32   : > { %s149_s8 = sshll.u32 %s142_s7, 4  ;;  %s1427_s17 = scalar_lea.hbm %s2206_s1, %s1078_s6  ;;  %s1429_s8 = int_to_ptr.vmem [resolvable:$true] %s149_s8 }
  0x33   : > { %s139_s28 = scalar_lea.sflag [#allocation7], %s1368_s23  ;;  %s1179_s30 = scalar_lea.hbm %s1427_s17, 512 }
  0x34   : > { %p1180_p3 = scmp.ne.s32.totalorder %s1427_s17, %s1179_s30  ;;  %s1184_s24 = scalar_lea.hbm %s2206_s1, 1024 }
  0x35   : > { %p1185_p0 = scmp.lt.u32.totalorder %s1427_s17, %s2206_s1  ;;  %p1186_p2 = scmp.lt.u32.totalorder %s1184_s24, %s1179_s30 }
  0x36   : > { %p1182_p8 = pnand %p1180_p3, %p1151_p1  ;;  %p1188_p5 = scmp.lt.u32.totalorder %s1179_s30, %s1427_s17 }
  0x37   : > { %p1187_p4 = por %p1186_p2, %p1185_p0 }
  0x38   : > { %p1183_p10 = pneg %p1182_p8 }
  0x39   : > { %p1189_p7 = por %p1188_p5, %p1187_p4 }
  0x3b   : > { %p1190_p9 = pnand %p1189_p7, %p1183_p10 }
  0x3d   : > { %1193 = shalt.err (!%p1190_p9)
}
  0x3e   : > { %s1194_s6 = scalar_lea.vmem %s1429_s8, 512  ;;  %s1284_s7 = smov [#allocation6]  }
  0x3f   : > { %p1195_p11 = scmp.ne.s32.totalorder %s1429_s8, %s1194_s6  ;;  %s1199_s14 = sshll.u32 %s1284_s7, 4  ;;  %s1200_s14 = int_to_ptr.vmem [resolvable:$false] %s1199_s14 }
  0x40   : > { %s1201_s16 = scalar_lea.vmem %s1200_s14, 1024  ;;  %p1202_p6 = scmp.lt.s32.totalorder %s1429_s8, %s1200_s14 }
  0x41   : > { %p1197_p3 = pnand %p1195_p11, %p1151_p1  ;;  %p1203_p0 = scmp.lt.s32.totalorder %s1201_s16, %s1194_s6 }
  0x43   : > { %p1198_p8 = pneg %p1197_p3  ;;  %p1204_p2 = por %p1203_p0, %p1202_p6 }
  0x45   : > { %p1205_p4 = pnand %p1204_p2, %p1198_p8 }
  0x47   : > { %1208 = shalt.err (!%p1205_p4)
}
  0x48   : > { %1100 = dma.hbm_to_vmem [thread:$0]  (!%p1379_p13), %s1427_s17, 512, %s1429_s8, %s139_s28, %s1282_s26, %s1282_s26, %s1283_s27  }
  0x49   : > { %161 = sbr.rel (%p1419_p12) target bundleno = 628 (0x274), region = 28  ;;  %s1463_s30 = sand.u32 (!%p1419_p12), 1, %s1271_s10  }
  0x4a   : > { %s1067_s4 = sshll.u32 (!%p1419_p12), %s1463_s30, 6  ;;  %s164_s3 = scalar_lea.sflag (!%p1419_p12), [#allocation4], %s1463_s30 }
  0x4b   : > { %s1469_s19 = scalar_lea.vmem (!%p1419_p12), [#allocation3], %s1067_s4  ;;  %p2216_p6 = scmp.ne.s32.totalorder (!%p1419_p12), %s2211_s20, 0 }
  0x50   : > { %1254 = dma.done.wait (%p2216_p6), %s164_s3, 1024  }
  0x51   : > { %1256 = vsyncadd (%p2216_p6), %s164_s3, 4294966272  ;;  %s1068_s23 = sshll.u32 %s1463_s30, 5  ;;  %s173_s26 = scalar_lea.sflag [#allocation7], %s1463_s30 }
  0x52   : > { %s1477_s27 = scalar_lea.vmem [#allocation6], %s1068_s23 }
  0x53   : > { %1258 = dma.done.wait (%p2216_p6), %s173_s26, 512  }
  0x54   : > { %1260 = vsyncadd (%p2216_p6), %s173_s26, 4294966784  ;;  %vm202_vm0 = vcmask 130048   ;;  %vm205_vm1 = vcmask 123904   ;;  %v1285_v0 = vmov 0.0   ;;  %v216_v1 = vld [vmem:[%s1469_s19] sm:$0xff]  ;;  %v218_v2 = vld [vmem:[%s1469_s19 + $0x10] sm:$0xff]  ;;  %v253_v31 = vlaneseq }
  0x55   : > { %203 = vst.msk [vmem:[#allocation2] sm:$0xff] %vm202_vm0, %v1285_v0  ;;  %204 = vst.msk [vmem:[#allocation2 + $0x8] sm:$0xff] %vm202_vm0, %v1285_v0  ;;  %v217_v3 = vld [vmem:[%s1469_s19 + $0x8] sm:$0xff]  ;;  %v219_v4 = vld [vmem:[%s1469_s19 + $0x18] sm:$0xff]  ;;  %s1286_s20 = smov 16   ;;  %s1287_s5 = smov 1  }
  0x56   : > { %207 = vst.msk [vmem:[#allocation2 + $0x18] sm:$0xff] %vm202_vm0, %v1285_v0  ;;  %208 = vst.msk [vmem:[#allocation2 + $0x20] sm:$0xff] %vm202_vm0, %v1285_v0  ;;  %v220_v5 = vld [vmem:[%s1469_s19 + $0x20] sm:$0xff]  ;;  %v221_v6 = vld [vmem:[%s1469_s19 + $0x28] sm:$0xff]  ;;  %v1574_v40 = vand.u32 127, %v253_v31  ;;  %s1288_s8 = smov 15  }
  0x57   : > { %210 = vst.msk [vmem:[#allocation2 + $0x30] sm:$0xff] %vm202_vm0, %v1285_v0  ;;  %211 = vst.msk [vmem:[#allocation2 + $0x38] sm:$0xff] %vm202_vm0, %v1285_v0  ;;  %v222_v7 = vld [vmem:[%s1469_s19 + $0x30] sm:$0xff]  ;;  %v223_v8 = vld [vmem:[%s1469_s19 + $0x38] sm:$0xff]  ;;  %s1289_s17 = smov 14   ;;  %s1290_s28 = smov 113  }
  0x58   : > { %213 = vst.msk [vmem:[#allocation2 + $0x48] sm:$0xff] %vm202_vm0, %v1285_v0  ;;  %214 = vst.msk [vmem:[#allocation2 + $0x50] sm:$0xff] %vm202_vm0, %v1285_v0  ;;  %v232_v13 = vld [vmem:[%s1477_s27] sm:$0xff]  ;;  %v1070_v16 = vld [vmem:[%s1477_s27 + $0x10] sm:$0xff]  ;;  %v298_v49 = vadd.s32 1, %v1574_v40  ;;  %v267_v62 = vadd.s32 4294967295, %v1574_v40 }
  0x59   : > { %206 = vst.msk [vmem:[#allocation2 + $0x10] sm:$0x3] %vm205_vm1, %v1285_v0  ;;  %209 = vst.msk [vmem:[#allocation2 + $0x28] sm:$0x3] %vm205_vm1, %v1285_v0  ;;  %v237_v17 = vfloor.f32 %v232_v13  ;;  %v239_v20 = vfloor.f32 %v1070_v16  ;;  %v233_v21 = vld [vmem:[%s1477_s27 + $0x8] sm:$0xff]  ;;  %v1071_v28 = vld [vmem:[%s1477_s27 + $0x18] sm:$0xff] }
  0x5a   : > { %212 = vst.msk [vmem:[#allocation2 + $0x40] sm:$0x3] %vm205_vm1, %v1285_v0  ;;  %215 = vst.msk [vmem:[#allocation2 + $0x58] sm:$0x3] %vm205_vm1, %v1285_v0  ;;  %v238_v25 = vfloor.f32 %v233_v21  ;;  %v240_v35 = vfloor.f32 %v1071_v28  ;;  %vm300_vm8 = vcmp.lt.s32.totalorder %v298_v49, 16  ;;  %vm268_vm12 = vcmp.ge.s32.totalorder %v267_v62, 0 }
  0x5b   : > { %224 = vst.msk [vmem:[#allocation2 + $0x1] sm:$0xff] %vm202_vm0, %v216_v1  ;;  %226 = vst.msk [vmem:[#allocation2 + $0x19] sm:$0xff] %vm202_vm0, %v218_v2  ;;  %v1080_v22 = vtrunc.f32 %v237_v17  ;;  %v1084_v26 = vtrunc.f32 %v239_v20  ;;  %v1559_v34 = vsub.f32 %v232_v13, %v237_v17  ;;  %v1568_v37 = vsub.f32 %v1070_v16, %v239_v20  ;;  %s201_s24 = scalar_lea.vmem [#allocation8], %s1067_s4  ;;  %s1079_s29 = sshll.u32 %s1330_s13, 10 }
  0x5c   : > { %225 = vst.msk [vmem:[#allocation2 + $0x9] sm:$0xff] %vm202_vm0, %v217_v3  ;;  %227 = vst.msk [vmem:[#allocation2 + $0x21] sm:$0xff] %vm202_vm0, %v219_v4  ;;  %v1082_v32 = vtrunc.f32 %v238_v25  ;;  %v1086_v44 = vtrunc.f32 %v240_v35  ;;  %v1593_v46 = vsub.f32 %v233_v21, %v238_v25  ;;  %v1609_v54 = vsub.f32 %v1071_v28, %v240_v35  ;;  %s961_s25 = sshll.u32 %s201_s24, 4  ;;  %s2160_s14 = scalar_lea.hbm %s2207_s2, %s1079_s29  ;;  %s2153_s25 = int_to_ptr.vmem [resolvable:$true] %s961_s25 }
  0x5d   : > { %228 = vst.msk [vmem:[#allocation2 + $0x31] sm:$0xff] %vm202_vm0, %v220_v5  ;;  %229 = vst.msk [vmem:[#allocation2 + $0x39] sm:$0xff] %vm202_vm0, %v221_v6  ;;  %v1546_v27 = vcvt.f32.s32 %v1080_v22  ;;  %v1557_v33 = vcvt.f32.s32 %v1084_v26  ;;  %v1579_v42 = vsub.f32 1.0, %v1559_v34  ;;  %v1591_v45 = vsub.f32 1.0, %v1568_v37  ;;  %s948_s13 = scalar_lea.sflag [#allocation5], %s1463_s30  ;;  %s1209_s16 = scalar_lea.vmem %s2153_s25, 1024 }
  0x5e   : > { %230 = vst.msk [vmem:[#allocation2 + $0x49] sm:$0xff] %vm202_vm0, %v222_v7  ;;  %231 = vst.msk [vmem:[#allocation2 + $0x51] sm:$0xff] %vm202_vm0, %v223_v8  ;;  %v1576_v41 = vcvt.f32.s32 %v1082_v32  ;;  %v1607_v53 = vcvt.f32.s32 %v1086_v44  ;;  %v1617_v56 = vsub.f32 1.0, %v1593_v46  ;;  %v252_v63 = vsub.f32 1.0, %v1609_v54  ;;  %p1210_p13 = scmp.ne.s32.totalorder %s2153_s25, %s1209_s16  ;;  %p2219_p1 = scmp.ne.s32.totalorder %s2212_s21, 0 }
  0x5f   : > { %v1562_v36 = vadd.s32 1, %v1546_v27  ;;  %v1582_v43 = vadd.s32 1, %v1557_v33  ;;  %vm288_vm2 = vcmp.eq.s32.totalorder %v1546_v27, 1  ;;  %vm304_vm4 = vcmp.eq.s32.totalorder %v1557_v33, 4294967295  ;;  %s1291_s4 = smov [#allocation8]  }
  0x60   : > { %v1602_v50 = vadd.s32 1, %v1576_v41  ;;  %v290_v51 = vsel %vm288_vm2, %v1579_v42, 0.0  ;;  %v306_v55 = vsel %vm304_vm4, %v1591_v45, 0.0  ;;  %vm289_vm6 = vcmp.eq.s32.totalorder %v1576_v41, 1  ;;  %p1211_p12 = pnand %p1210_p13, %p2219_p1  ;;  %s1213_s3 = sshll.u32 %s1291_s4, 4  ;;  %s1214_s3 = int_to_ptr.vmem [resolvable:$false] %s1213_s3 }
  0x61   : > { %vm292_vm3 = vcmp.eq.s32.totalorder %v1562_v36, 1  ;;  %vm310_vm5 = vcmp.eq.s32.totalorder %v1582_v43, 4294967295  ;;  %v309_v61 = vadd.s32 1, %v1607_v53  ;;  %v291_v1 = vsel %vm289_vm6, %v1617_v56, 0.0  ;;  %s1215_s19 = scalar_lea.vmem %s1214_s3, 2048  ;;  %p1216_p5 = scmp.lt.s32.totalorder %s2153_s25, %s1214_s3 }
  0x62   : > { %v1507_v9 = vld [vmem:[#allocation2] sm:$0xff]  ;;  %v1509_v10 = vld [vmem:[#allocation2 + $0x18] sm:$0xff]  ;;  %v294_v52 = vsel %vm292_vm3, %v1559_v34, 0.0  ;;  %v312_v60 = vsel %vm310_vm5, %v1568_v37, 0.0  ;;  %vm293_vm7 = vcmp.eq.s32.totalorder %v1602_v50, 1  ;;  %vm305_vm9 = vcmp.eq.s32.totalorder %v1607_v53, 4294967295  ;;  %p1212_p10 = pneg %p1211_p12  ;;  %p1217_p7 = scmp.lt.s32.totalorder %s1215_s19, %s1209_s16 }
  0x63   : > { %327 = vrot.lane.b32.xlu0 %v1507_v9, %s1286_s20  ;;  %333 = vrot.lane.b32.xlu1 %v1509_v10, %s1286_s20  ;;  %v1515_v11 = vld [vmem:[#allocation2 + $0x8] sm:$0xff]  ;;  %v1517_v12 = vld [vmem:[#allocation2 + $0x20] sm:$0xff]  ;;  %v296_v59 = vadd.f32 %v294_v52, %v290_v51  ;;  %v1633_v0 = vadd.f32 %v312_v60, %v306_v55  ;;  %v295_v2 = vsel %vm293_vm7, %v1593_v46, 0.0  ;;  %vm507_vm10 = vcmp.eq.s32.totalorder %v1557_v33, 0 }
  0x64   : > { %v1524_v14 = vld [vmem:[#allocation2 + $0x30] sm:$0xff]  ;;  %v1526_v15 = vld [vmem:[#allocation2 + $0x38] sm:$0xff]  ;;  %v1542_v23 = vld [vmem:[#allocation2 + $0x1] sm:$0xff]  ;;  %vm311_vm11 = vcmp.eq.s32.totalorder %v309_v61, 4294967295  ;;  %vm269_vm13 = vcmp.lt.s32.totalorder %v267_v62, 16  ;;  %v297_v6 = vadd.f32 %v295_v2, %v291_v1  ;;  %v307_v7 = vsel %vm305_vm9, %v252_v63, 0.0  ;;  %p1218_p9 = por %p1217_p7, %p1216_p5 }
  0x65   : > { %v1533_v18 = vld [vmem:[#allocation2 + $0x48] sm:$0xff]  ;;  %v1535_v19 = vld [vmem:[#allocation2 + $0x50] sm:$0xff]  ;;  %v1553_v29 = vld [vmem:[#allocation2 + $0x19] sm:$0xff]  ;;  %v1643_v5 = vsel %vm300_vm8, %v296_v59, 0.0  ;;  %vm255_vm14 = vcmp.eq.s32.totalorder %v1546_v27, 4294967295  ;;  %vm261_vm15 = vcmp.eq.s32.totalorder %v1562_v36, 4294967295 }
  0x66   : > { %v1544_v24 = vld [vmem:[#allocation2 + $0x9] sm:$0xff]  ;;  %v1555_v30 = vld [vmem:[#allocation2 + $0x21] sm:$0xff]  ;;  %v1570_v38 = vld [vmem:[#allocation2 + $0x31] sm:$0xff]  ;;  %v449_v8 = vmul.f32 %v1633_v0, %v1643_v5  ;;  %v509_v13 = vsel %vm507_vm10, %v1591_v45, 0.0  ;;  %vm511_vm1 = vcmp.eq.s32.totalorder %v1582_v43, 0  ;;  %vm508_vm2 = vcmp.eq.s32.totalorder %v1607_v53, 0  ;;  %p1219_p11 = pnand %p1218_p9, %p1212_p10 }
  0x67   : > { %330 = vrot.lane.b32.xlu0 %v1515_v11, %s1286_s20  ;;  %336 = vrot.lane.b32.xlu1 %v1517_v12, %s1286_s20  ;;  %v1572_v39 = vld [vmem:[#allocation2 + $0x39] sm:$0xff]  ;;  %v1595_v47 = vld [vmem:[#allocation2 + $0x49] sm:$0xff]  ;;  %v1597_v48 = vld [vmem:[#allocation2 + $0x51] sm:$0xff]  ;;  %v313_v20 = vsel %vm311_vm11, %v1609_v54, 0.0  ;;  %vm512_vm3 = vcmp.eq.s32.totalorder %v309_v61, 0  ;;  %vm256_vm4 = vcmp.eq.s32.totalorder %v1576_v41, 4294967295 }
  0x68   : > { %v1619_v57 = vld [vmem:[#allocation2 + $0x2] sm:$0xff]  ;;  %v1621_v58 = vld [vmem:[#allocation2 + $0xa] sm:$0xff]  ;;  %v1638_v3 = vld [vmem:[#allocation2 + $0x1a] sm:$0xff]  ;;  %vm262_vm5 = vcmp.eq.s32.totalorder %v1602_v50, 4294967295  ;;  %vm707_vm6 = vcmp.eq.s32.totalorder %v1557_v33, 1  ;;  %vm711_vm7 = vcmp.eq.s32.totalorder %v1582_v43, 1  ;;  %v315_v28 = vadd.f32 %v313_v20, %v307_v7 }
  0x69   : > { %v1640_v4 = vld [vmem:[#allocation2 + $0x22] sm:$0xff]  ;;  %v1657_v16 = vld [vmem:[#allocation2 + $0x32] sm:$0xff]  ;;  %v1659_v17 = vld [vmem:[#allocation2 + $0x3a] sm:$0xff]  ;;  %v257_v21 = vsel %vm255_vm14, %v1579_v42, 0.0  ;;  %v263_v22 = vsel %vm261_vm15, %v1559_v34, 0.0  ;;  %v303_v25 = vsel %vm300_vm8, %v297_v6, 0.0 }
  0x6a   : > { %v513_v26 = vsel %vm511_vm1, %v1568_v37, 0.0  ;;  %vm708_vm9 = vcmp.eq.s32.totalorder %v1607_v53, 1  ;;  %vm712_vm10 = vcmp.eq.s32.totalorder %v309_v61, 1  ;;  %v510_v31 = vsel %vm508_vm2, %v252_v63, 0.0  ;;  %v1683_v44 = vld [vmem:[#allocation2 + $0x4a] sm:$0xff]  ;;  %v1685_v49 = vld [vmem:[#allocation2 + $0x52] sm:$0xff]  ;;  %vm1700_vm8 = vmand %vm268_vm12, %vm269_vm13 }
  0x6b   : > { %339 = vrot.lane.b32.xlu0 %v1524_v14, %s1286_s20  ;;  %342 = vrot.lane.b32.xlu1 %v1526_v15, %s1286_s20  ;;  %v258_v32 = vsel %vm256_vm4, %v1617_v56, 0.0  ;;  %v264_v35 = vsel %vm262_vm5, %v1593_v46, 0.0  ;;  %v514_v51 = vsel %vm512_vm3, %v1609_v54, 0.0  ;;  %v709_v52 = vsel %vm707_vm6, %v1591_v45, 0.0 }
  0x6c   : > { %v713_v53 = vsel %vm711_vm7, %v1568_v37, 0.0  ;;  %v265_v55 = vadd.f32 %v263_v22, %v257_v21  ;;  %v1695_v59 = vadd.f32 %v513_v26, %v509_v13  ;;  %v710_v60 = vsel %vm708_vm9, %v252_v63, 0.0 }
  0x6d   : > { %v714_v1 = vsel %vm712_vm10, %v1609_v54, 0.0  ;;  %vm273_vm11 = vcmp.eq.s32.totalorder %v1546_v27, 0  ;;  %v266_v33 = vadd.f32 %v264_v35, %v258_v32  ;;  %vm277_vm14 = vcmp.eq.s32.totalorder %v1562_v36, 0 }
  0x6e   : > { %vm274_vm15 = vcmp.eq.s32.totalorder %v1576_v41, 0  ;;  %vm278_vm1 = vcmp.eq.s32.totalorder %v1602_v50, 0  ;;  %v450_v37 = vmul.f32 %v315_v28, %v303_v25  ;;  %v516_v43 = vadd.f32 %v514_v51, %v510_v31 }
  0x6f   : > { %345 = vrot.lane.b32.xlu0 %v1533_v18, %s1286_s20  ;;  %348 = vrot.lane.b32.xlu1 %v1535_v19, %s1286_s20  ;;  %v715_v45 = vadd.f32 %v713_v53, %v709_v52  ;;  %v716_v54 = vadd.f32 %v714_v1, %v710_v60  ;;  %v271_v27 = vsel %vm1700_vm8, %v265_v55, 0.0  ;;  %v275_v61 = vsel %vm273_vm11, %v1579_v42, 0.0 }
  0x70   : > { %v279_v36 = vsel %vm277_vm14, %v1559_v34, 0.0  ;;  %v276_v41 = vsel %vm274_vm15, %v1617_v56, 0.0  ;;  %v280_v50 = vsel %vm278_vm1, %v1593_v46, 0.0  ;;  %v272_v63 = vsel %vm1700_vm8, %v266_v33, 0.0 }
  0x71   : > { %v1718_v62 = vmul.f32 %v715_v45, %v271_v27  ;;  %v649_v6 = vmul.f32 %v1695_v59, %v1643_v5  ;;  %v650_v7 = vmul.f32 %v516_v43, %v303_v25  ;;  %v1724_v13 = vmul.f32 %v716_v54, %v272_v63 }
  0x72   : > { %v281_v42 = vadd.f32 %v279_v36, %v275_v61  ;;  %v282_v34 = vadd.f32 %v280_v50, %v276_v41  ;;  %vm284_vm12 = vcmp.lt.s32.totalorder %v1574_v40, 16  ;;  %v849_v46 = vmul.f32 %v715_v45, %v1643_v5 }
  0x73   : > { %527 = vrot.lane.b32.xlu0 %v1542_v23, %s1286_s20  ;;  %530 = vrot.lane.b32.xlu1 %v1544_v24, %s1286_s20  ;;  %v850_v56 = vmul.f32 %v716_v54, %v303_v25  ;;  %v325_v22 = vmul.f32 %v315_v28, %v272_v63  ;;  %v525_v55 = vmul.f32 %v1695_v59, %v271_v27  ;;  %vm326_vm13 = vcmask 1047680  }
  0x74   : > { %v286_v20 = vsel %vm284_vm12, %v281_v42, 0.0  ;;  %v287_v21 = vsel %vm284_vm12, %v282_v34, 0.0  ;;  %v526_v60 = vmul.f32 %v516_v43, %v272_v63 }
  0x75   : > { %v399_v26 = vmul.f32 %v1633_v0, %v286_v20  ;;  %v400_v31 = vmul.f32 %v315_v28, %v287_v21  ;;  %v1730_v32 = vmul.f32 %v715_v45, %v286_v20  ;;  %v1736_v25 = vmul.f32 %v716_v54, %v287_v21 }
  0x76   : > { %v1754_v1 = vmul.f32 %v1695_v59, %v286_v20  ;;  %v1756_v2 = vmul.f32 %v516_v43, %v287_v21 }
  0x77   : > { %533 = vrot.lane.b32.xlu0 %v1553_v29, %s1286_s20  ;;  %536 = vrot.lane.b32.xlu1 %v1555_v30, %s1286_s20  ;;  %v401_v40 = vmul.f32 %v399_v26, %v1507_v9  ;;  %v402_v5 = vmul.f32 %v400_v31, %v1515_v11  ;;  %v404_v28 = vmul.f32 %v400_v31, %v1517_v12 }
  0x78   : > { %v405_v35 = vmul.f32 %v399_v26, %v1524_v14  ;;  %v406_v51 = vmul.f32 %v400_v31, %v1526_v15  ;;  %v407_v52 = vmul.f32 %v399_v26, %v1533_v18  ;;  %v408_v53 = vmul.f32 %v400_v31, %v1535_v19 }
  0x79   : > { %v601_v33 = vmul.f32 %v1754_v1, %v1542_v23 }
  0x7b   : > { %539 = vrot.lane.b32.xlu0 %v1570_v38, %s1286_s20  ;;  %542 = vrot.lane.b32.xlu1 %v1572_v39, %s1286_s20 }
  0x7f   : > { %545 = vrot.lane.b32.xlu0 %v1595_v47, %s1286_s20  ;;  %548 = vrot.lane.b32.xlu1 %v1597_v48, %s1286_s20 }
  0x83   : > { %727 = vrot.lane.b32.xlu0 %v1619_v57, %s1286_s20  ;;  %730 = vrot.lane.b32.xlu1 %v1621_v58, %s1286_s20 }
  0x87   : > { %733 = vrot.lane.b32.xlu0 %v1638_v3, %s1286_s20  ;;  %736 = vrot.lane.b32.xlu1 %v1640_v4, %s1286_s20 }
  0x8b   : > { %739 = vrot.lane.b32.xlu0 %v1657_v16, %s1286_s20  ;;  %742 = vrot.lane.b32.xlu1 %v1659_v17, %s1286_s20 }
  0x8f   : > { %745 = vrot.lane.b32.xlu0 %v1683_v44, %s1286_s20  ;;  %748 = vrot.lane.b32.xlu1 %v1685_v49, %s1286_s20 }
  0x93   : > { %453 = vrot.lane.b32.xlu0 %v449_v8, %s1287_s5  ;;  %455 = vrot.lane.b32.xlu1 %v450_v37, %s1287_s5  ;;  %v324_v8 = vmul.f32 %v1633_v0, %v271_v27  ;;  %v403_v0 = vmul.f32 %v399_v26, %v1509_v10  ;;  %v602_v37 = vmul.f32 %v1756_v2, %v1544_v24 }
  0x97   : > { %653 = vrot.lane.b32.xlu0 %v649_v6, %s1287_s5  ;;  %655 = vrot.lane.b32.xlu1 %v650_v7, %s1287_s5 }
  0x9b   : > { %853 = vrot.lane.b32.xlu0 %v849_v46, %s1287_s5  ;;  %855 = vrot.lane.b32.xlu1 %v850_v56, %s1287_s5 }
  0x9f   : > { %377 = vrot.lane.b32.xlu0 %v324_v8, %s1288_s8  ;;  %379 = vrot.lane.b32.xlu1 %v325_v22, %s1288_s8 }
  0xa3   : > { %417 = vrot.lane.b32.xlu0 %v401_v40, %s1288_s8  ;;  %419 = vrot.lane.b32.xlu1 %v402_v5, %s1288_s8 }
  0xa7   : > { %421 = vrot.lane.b32.xlu0 %v403_v0, %s1288_s8  ;;  %423 = vrot.lane.b32.xlu1 %v404_v28, %s1288_s8 }
  0xab   : > { %425 = vrot.lane.b32.xlu0 %v405_v35, %s1288_s8  ;;  %427 = vrot.lane.b32.xlu1 %v406_v51, %s1288_s8 }
  0xaf   : > { %429 = vrot.lane.b32.xlu0 %v407_v52, %s1288_s8  ;;  %431 = vrot.lane.b32.xlu1 %v408_v53, %s1288_s8 }
  0xb3   : > { %577 = vrot.lane.b32.xlu0 %v525_v55, %s1288_s8  ;;  %579 = vrot.lane.b32.xlu1 %v526_v60, %s1288_s8 }
  0xb7   : > { %617 = vrot.lane.b32.xlu0 %v601_v33, %s1288_s8  ;;  %619 = vrot.lane.b32.xlu1 %v602_v37, %s1288_s8 }
  0xd5   : > { %v328_v45 = vpop.permute.xlu0 %327  ;;  %v334_v59 = vpop.permute.xlu1 %333 }
  0xd6   : > { %v329_v43 = vsel %vm326_vm13, %v328_v45, %v1507_v9  ;;  %v335_v54 = vsel %vm326_vm13, %v334_v59, %v1509_v10 }
  0xd7   : > { %351 = vrot.lane.b32.xlu0 %v329_v43, %s1286_s20 }
  0xd9   : > { %v331_v27 = vpop.permute.xlu0 %330  ;;  %v337_v61 = vpop.permute.xlu1 %336 }
  0xda   : > { %v332_v36 = vsel %vm326_vm13, %v331_v27, %v1515_v11  ;;  %v338_v41 = vsel %vm326_vm13, %v337_v61, %v1517_v12 }
  0xdb   : > { %353 = vrot.lane.b32.xlu1 %v332_v36, %s1286_s20  ;;  %355 = vrot.lane.b32.xlu0 %v335_v54, %s1286_s20 }
  0xdd   : > { %v340_v50 = vpop.permute.xlu0 %339  ;;  %v343_v63 = vpop.permute.xlu1 %342 }
  0xde   : > { %v341_v6 = vsel %vm326_vm13, %v340_v50, %v1524_v14  ;;  %v344_v7 = vsel %vm326_vm13, %v343_v63, %v1526_v15 }
  0xdf   : > { %357 = vrot.lane.b32.xlu1 %v338_v41, %s1286_s20  ;;  %359 = vrot.lane.b32.xlu0 %v341_v6, %s1286_s20 }
  0xe1   : > { %v346_v42 = vpop.permute.xlu0 %345  ;;  %v349_v34 = vpop.permute.xlu1 %348 }
  0xe2   : > { %v347_v46 = vsel %vm326_vm13, %v346_v42, %v1533_v18  ;;  %v350_v56 = vsel %vm326_vm13, %v349_v34, %v1535_v19  ;;  %v603_v34 = vmul.f32 %v1754_v1, %v1553_v29 }
  0xe3   : > { %361 = vrot.lane.b32.xlu1 %v344_v7, %s1286_s20  ;;  %363 = vrot.lane.b32.xlu0 %v347_v46, %s1286_s20 }
  0xe5   : > { %v528_v20 = vpop.permute.xlu0 %527  ;;  %v531_v21 = vpop.permute.xlu1 %530 }
  0xe6   : > { %v529_v8 = vsel %vm326_vm13, %v528_v20, %v1542_v23  ;;  %v532_v22 = vsel %vm326_vm13, %v531_v21, %v1544_v24  ;;  %v605_v20 = vmul.f32 %v1754_v1, %v1570_v38  ;;  %v606_v21 = vmul.f32 %v1756_v2, %v1572_v39 }
  0xe7   : > { %365 = vrot.lane.b32.xlu1 %v350_v56, %s1286_s20  ;;  %551 = vrot.lane.b32.xlu0 %v529_v8, %s1286_s20  ;;  %v604_v56 = vmul.f32 %v1756_v2, %v1555_v30  ;;  %v607_v8 = vmul.f32 %v1754_v1, %v1595_v47  ;;  %v801_v1 = vmul.f32 %v1730_v32, %v1619_v57 }
  0xe9   : > { %v534_v26 = vpop.permute.xlu0 %533  ;;  %v537_v31 = vpop.permute.xlu1 %536 }
  0xea   : > { %v535_v40 = vsel %vm326_vm13, %v534_v26, %v1553_v29  ;;  %v538_v5 = vsel %vm326_vm13, %v537_v31, %v1555_v30  ;;  %v608_v26 = vmul.f32 %v1756_v2, %v1597_v48  ;;  %v802_v2 = vmul.f32 %v1736_v25, %v1621_v58 }
  0xeb   : > { %553 = vrot.lane.b32.xlu1 %v532_v22, %s1286_s20  ;;  %555 = vrot.lane.b32.xlu0 %v535_v40, %s1286_s20 }
  0xed   : > { %v540_v0 = vpop.permute.xlu0 %539  ;;  %v543_v28 = vpop.permute.xlu1 %542 }
  0xee   : > { %v541_v35 = vsel %vm326_vm13, %v540_v0, %v1570_v38  ;;  %v544_v51 = vsel %vm326_vm13, %v543_v28, %v1572_v39  ;;  %v803_v0 = vmul.f32 %v1730_v32, %v1638_v3 }
  0xef   : > { %557 = vrot.lane.b32.xlu1 %v538_v5, %s1286_s20  ;;  %559 = vrot.lane.b32.xlu0 %v541_v35, %s1286_s20 }
  0xf1   : > { %v546_v52 = vpop.permute.xlu0 %545  ;;  %v549_v53 = vpop.permute.xlu1 %548 }
  0xf2   : > { %v547_v55 = vsel %vm326_vm13, %v546_v52, %v1595_v47  ;;  %v550_v60 = vsel %vm326_vm13, %v549_v53, %v1597_v48  ;;  %v806_v52 = vmul.f32 %v1736_v25, %v1659_v17  ;;  %v807_v53 = vmul.f32 %v1730_v32, %v1683_v44 }
  0xf3   : > { %561 = vrot.lane.b32.xlu1 %v544_v51, %s1286_s20  ;;  %563 = vrot.lane.b32.xlu0 %v547_v55, %s1286_s20 }
  0xf5   : > { %v728_v33 = vpop.permute.xlu0 %727  ;;  %v731_v37 = vpop.permute.xlu1 %730 }
  0xf6   : > { %v729_v45 = vsel %vm326_vm13, %v728_v33, %v1619_v57  ;;  %v732_v59 = vsel %vm326_vm13, %v731_v37, %v1621_v58 }
  0xf7   : > { %565 = vrot.lane.b32.xlu1 %v550_v60, %s1286_s20  ;;  %751 = vrot.lane.b32.xlu0 %v729_v45, %s1286_s20  ;;  %v808_v60 = vmul.f32 %v1736_v25, %v1685_v49 }
  0xf9   : > { %v734_v43 = vpop.permute.xlu0 %733  ;;  %v737_v54 = vpop.permute.xlu1 %736 }
  0xfa   : > { %v735_v27 = vsel %vm326_vm13, %v734_v43, %v1638_v3  ;;  %v738_v61 = vsel %vm326_vm13, %v737_v54, %v1640_v4 }
  0xfb   : > { %753 = vrot.lane.b32.xlu1 %v732_v59, %s1286_s20  ;;  %755 = vrot.lane.b32.xlu0 %v735_v27, %s1286_s20 }
  0xfd   : > { %v740_v36 = vpop.permute.xlu0 %739  ;;  %v743_v41 = vpop.permute.xlu1 %742 }
  0xfe   : > { %v741_v50 = vsel %vm326_vm13, %v740_v36, %v1657_v16  ;;  %v744_v63 = vsel %vm326_vm13, %v743_v41, %v1659_v17 }
  0xff   : > { %757 = vrot.lane.b32.xlu1 %v738_v61, %s1286_s20  ;;  %759 = vrot.lane.b32.xlu0 %v741_v50, %s1286_s20 }
 0x101   : > { %v746_v6 = vpop.permute.xlu0 %745  ;;  %v749_v7 = vpop.permute.xlu1 %748 }
 0x102   : > { %v747_v42 = vsel %vm326_vm13, %v746_v6, %v1683_v44  ;;  %v750_v46 = vsel %vm326_vm13, %v749_v7, %v1685_v49 }
 0x103   : > { %761 = vrot.lane.b32.xlu1 %v744_v63, %s1286_s20  ;;  %763 = vrot.lane.b32.xlu0 %v747_v42, %s1286_s20 }
 0x105   : > { %v1851_v22 = vpop.permute.xlu0 %453  ;;  %v1857_v31 = vpop.permute.xlu1 %455 }
 0x107   : > { %765 = vrot.lane.b32.xlu1 %v750_v46, %s1286_s20  ;;  %621 = vrot.lane.b32.xlu0 %v603_v34, %s1288_s8 }
 0x109   : > { %v1862_v40 = vpop.permute.xlu0 %653  ;;  %v1868_v5 = vpop.permute.xlu1 %655 }
 0x10b   : > { %623 = vrot.lane.b32.xlu1 %v604_v56, %s1288_s8  ;;  %625 = vrot.lane.b32.xlu0 %v605_v20, %s1288_s8 }
 0x10d   : > { %v1875_v28 = vpop.permute.xlu0 %853  ;;  %v1883_v35 = vpop.permute.xlu1 %855 }
 0x10f   : > { %627 = vrot.lane.b32.xlu1 %v606_v21, %s1288_s8  ;;  %629 = vrot.lane.b32.xlu0 %v607_v8, %s1288_s8 }
 0x111   : > { %v378_v51 = vpop.permute.xlu0 %377  ;;  %v1891_v55 = vpop.permute.xlu1 %379 }
 0x113   : > { %631 = vrot.lane.b32.xlu1 %v608_v26, %s1288_s8  ;;  %777 = vrot.lane.b32.xlu0 %v1718_v62, %s1288_s8  ;;  %v804_v62 = vmul.f32 %v1736_v25, %v1640_v4 }
 0x115   : > { %v418_v33 = vpop.permute.xlu0 %417  ;;  %v420_v37 = vpop.permute.xlu1 %419 }
 0x117   : > { %779 = vrot.lane.b32.xlu1 %v1724_v13, %s1288_s8  ;;  %817 = vrot.lane.b32.xlu0 %v801_v1, %s1288_s8  ;;  %v805_v13 = vmul.f32 %v1730_v32, %v1657_v16 }
 0x119   : > { %v422_v45 = vpop.permute.xlu0 %421  ;;  %v424_v59 = vpop.permute.xlu1 %423 }
 0x11b   : > { %819 = vrot.lane.b32.xlu1 %v802_v2, %s1288_s8  ;;  %821 = vrot.lane.b32.xlu0 %v803_v0, %s1288_s8 }
 0x11d   : > { %v426_v43 = vpop.permute.xlu0 %425  ;;  %v428_v54 = vpop.permute.xlu1 %427 }
 0x11f   : > { %823 = vrot.lane.b32.xlu1 %v804_v62, %s1288_s8  ;;  %825 = vrot.lane.b32.xlu0 %v805_v13, %s1288_s8 }
 0x121   : > { %v430_v27 = vpop.permute.xlu0 %429  ;;  %v432_v61 = vpop.permute.xlu1 %431 }
 0x123   : > { %827 = vrot.lane.b32.xlu1 %v806_v52, %s1288_s8  ;;  %829 = vrot.lane.b32.xlu0 %v807_v53, %s1288_s8 }
 0x125   : > { %v1898_v32 = vpop.permute.xlu0 %577  ;;  %v1900_v36 = vpop.permute.xlu1 %579 }
 0x127   : > { %831 = vrot.lane.b32.xlu1 %v808_v60, %s1288_s8 }
 0x129   : > { %v1902_v41 = vpop.permute.xlu0 %617  ;;  %v1904_v50 = vpop.permute.xlu1 %619 }
 0x149   : > { %v352_v63 = vpop.permute.xlu0 %351 }
 0x14a   : > { %v367_v25 = vsel %vm326_vm13, %v352_v63, %v1507_v9 }
 0x14b   : > { %v383_v6 = vmul.f32 %v378_v51, %v367_v25  ;;  %v459_v7 = vmul.f32 %v1851_v22, %v367_v25 }
 0x14d   : > { %v354_v42 = vpop.permute.xlu1 %353  ;;  %475 = vrot.lane.b32.xlu0 %v459_v7, %s1289_s17  ;;  %v356_v34 = vpop.permute.xlu0 %355  ;;  %v1910_v46 = vadd.f32 %v418_v33, %v383_v6 }
 0x14e   : > { %v368_v56 = vsel %vm326_vm13, %v354_v42, %v1515_v11  ;;  %v369_v20 = vsel %vm326_vm13, %v356_v34, %v1509_v10 }
 0x14f   : > { %v384_v21 = vmul.f32 %v1891_v55, %v368_v56  ;;  %v460_v9 = vmul.f32 %v1857_v31, %v368_v56  ;;  %v385_v8 = vmul.f32 %v378_v51, %v369_v20  ;;  %v461_v26 = vmul.f32 %v1851_v22, %v369_v20 }
 0x151   : > { %477 = vrot.lane.b32.xlu1 %v460_v9, %s1289_s17  ;;  %v358_v1 = vpop.permute.xlu1 %357  ;;  %479 = vrot.lane.b32.xlu0 %v461_v26, %s1289_s17  ;;  %v360_v2 = vpop.permute.xlu0 %359  ;;  %v1921_v0 = vadd.f32 %v420_v37, %v384_v21  ;;  %v1923_v62 = vadd.f32 %v422_v45, %v385_v8 }
 0x152   : > { %v370_v10 = vsel %vm326_vm13, %v358_v1, %v1517_v12  ;;  %v371_v11 = vsel %vm326_vm13, %v360_v2, %v1524_v14 }
 0x153   : > { %v386_v13 = vmul.f32 %v1891_v55, %v370_v10  ;;  %v462_v52 = vmul.f32 %v1857_v31, %v370_v10  ;;  %v387_v53 = vmul.f32 %v378_v51, %v371_v11  ;;  %v463_v60 = vmul.f32 %v1851_v22, %v371_v11 }
 0x155   : > { %481 = vrot.lane.b32.xlu1 %v462_v52, %s1289_s17  ;;  %v362_v33 = vpop.permute.xlu1 %361  ;;  %483 = vrot.lane.b32.xlu0 %v463_v60, %s1289_s17  ;;  %v364_v37 = vpop.permute.xlu0 %363  ;;  %v1934_v45 = vadd.f32 %v424_v59, %v386_v13  ;;  %v1936_v63 = vadd.f32 %v426_v43, %v387_v53 }
 0x156   : > { %v372_v12 = vsel %vm326_vm13, %v362_v33, %v1526_v15  ;;  %v373_v14 = vsel %vm326_vm13, %v364_v37, %v1533_v18 }
 0x157   : > { %v388_v25 = vmul.f32 %v1891_v55, %v372_v12  ;;  %v464_v6 = vmul.f32 %v1857_v31, %v372_v12  ;;  %v389_v7 = vmul.f32 %v378_v51, %v373_v14  ;;  %v465_v42 = vmul.f32 %v1851_v22, %v373_v14 }
 0x159   : > { %485 = vrot.lane.b32.xlu1 %v464_v6, %s1289_s17  ;;  %v366_v34 = vpop.permute.xlu1 %365  ;;  %487 = vrot.lane.b32.xlu0 %v465_v42, %s1289_s17  ;;  %v552_v59 = vpop.permute.xlu0 %551  ;;  %v1947_v43 = vadd.f32 %v428_v54, %v388_v25  ;;  %v1949_v56 = vadd.f32 %v430_v27, %v389_v7 }
 0x15a   : > { %v374_v15 = vsel %vm326_vm13, %v366_v34, %v1535_v19  ;;  %v567_v18 = vsel %vm326_vm13, %v552_v59, %v1542_v23 }
 0x15b   : > { %v390_v51 = vmul.f32 %v1891_v55, %v374_v15  ;;  %v466_v22 = vmul.f32 %v1857_v31, %v374_v15  ;;  %v1958_v20 = vmul.f32 %v1898_v32, %v567_v18  ;;  %v659_v21 = vmul.f32 %v1862_v40, %v567_v18 }
 0x15d   : > { %489 = vrot.lane.b32.xlu1 %v466_v22, %s1289_s17  ;;  %v554_v54 = vpop.permute.xlu1 %553  ;;  %675 = vrot.lane.b32.xlu0 %v659_v21, %s1289_s17  ;;  %v556_v27 = vpop.permute.xlu0 %555  ;;  %v1963_v9 = vadd.f32 %v432_v61, %v390_v51 }
 0x15e   : > { %v1967_v19 = vsel %vm326_vm13, %v554_v54, %v1544_v24  ;;  %v569_v23 = vsel %vm326_vm13, %v556_v27, %v1553_v29 }
 0x15f   : > { %v660_v31 = vmul.f32 %v1868_v5, %v1967_v19  ;;  %v1974_v55 = vmul.f32 %v1898_v32, %v569_v23  ;;  %v661_v8 = vmul.f32 %v1862_v40, %v569_v23 }
 0x161   : > { %677 = vrot.lane.b32.xlu1 %v660_v31, %s1289_s17  ;;  %v558_v26 = vpop.permute.xlu1 %557  ;;  %679 = vrot.lane.b32.xlu0 %v661_v8, %s1289_s17  ;;  %v560_v61 = vpop.permute.xlu0 %559 }
 0x162   : > { %v1981_v24 = vsel %vm326_vm13, %v558_v26, %v1555_v30  ;;  %v571_v29 = vsel %vm326_vm13, %v560_v61, %v1570_v38 }
 0x163   : > { %v662_v1 = vmul.f32 %v1868_v5, %v1981_v24  ;;  %v1988_v2 = vmul.f32 %v1898_v32, %v571_v29  ;;  %v663_v10 = vmul.f32 %v1862_v40, %v571_v29 }
 0x165   : > { %681 = vrot.lane.b32.xlu1 %v662_v1, %s1289_s17  ;;  %v562_v11 = vpop.permute.xlu1 %561  ;;  %683 = vrot.lane.b32.xlu0 %v663_v10, %s1289_s17  ;;  %v564_v13 = vpop.permute.xlu0 %563 }
 0x166   : > { %v1995_v30 = vsel %vm326_vm13, %v562_v11, %v1572_v39  ;;  %v573_v38 = vsel %vm326_vm13, %v564_v13, %v1595_v47 }
 0x167   : > { %v664_v52 = vmul.f32 %v1868_v5, %v1995_v30  ;;  %v2002_v53 = vmul.f32 %v1898_v32, %v573_v38  ;;  %v665_v60 = vmul.f32 %v1862_v40, %v573_v38 }
 0x169   : > { %685 = vrot.lane.b32.xlu1 %v664_v52, %s1289_s17  ;;  %v566_v33 = vpop.permute.xlu1 %565  ;;  %687 = vrot.lane.b32.xlu0 %v665_v60, %s1289_s17  ;;  %v752_v37 = vpop.permute.xlu0 %751 }
 0x16a   : > { %v2009_v39 = vsel %vm326_vm13, %v566_v33, %v1597_v48  ;;  %v2013_v47 = vsel %vm326_vm13, %v752_v37, %v1619_v57 }
 0x16b   : > { %v666_v32 = vmul.f32 %v1868_v5, %v2009_v39  ;;  %v859_v40 = vmul.f32 %v1875_v28, %v2013_v47 }
 0x16d   : > { %689 = vrot.lane.b32.xlu1 %v666_v32, %s1289_s17  ;;  %v754_v12 = vpop.permute.xlu1 %753  ;;  %875 = vrot.lane.b32.xlu0 %v859_v40, %s1289_s17  ;;  %v756_v14 = vpop.permute.xlu0 %755  ;;  %v584_v32 = vmul.f32 %v1900_v36, %v1967_v19 }
 0x16e   : > { %v2023_v48 = vsel %vm326_vm13, %v754_v12, %v1621_v58  ;;  %v2027_v57 = vsel %vm326_vm13, %v756_v14, %v1638_v3 }
 0x16f   : > { %v860_v5 = vmul.f32 %v1883_v35, %v2023_v48  ;;  %v861_v25 = vmul.f32 %v1875_v28, %v2027_v57 }
 0x171   : > { %877 = vrot.lane.b32.xlu1 %v860_v5, %s1289_s17  ;;  %v758_v6 = vpop.permute.xlu1 %757  ;;  %879 = vrot.lane.b32.xlu0 %v861_v25, %s1289_s17  ;;  %v760_v7 = vpop.permute.xlu0 %759 }
 0x172   : > { %v2037_v58 = vsel %vm326_vm13, %v758_v6, %v1640_v4  ;;  %v2041_v3 = vsel %vm326_vm13, %v760_v7, %v1657_v16  ;;  %v586_v7 = vmul.f32 %v1900_v36, %v1981_v24 }
 0x173   : > { %v862_v42 = vmul.f32 %v1883_v35, %v2037_v58  ;;  %v863_v34 = vmul.f32 %v1875_v28, %v2041_v3 }
 0x175   : > { %881 = vrot.lane.b32.xlu1 %v862_v42, %s1289_s17  ;;  %v762_v59 = vpop.permute.xlu1 %761  ;;  %883 = vrot.lane.b32.xlu0 %v863_v34, %s1289_s17  ;;  %v764_v15 = vpop.permute.xlu0 %763 }
 0x176   : > { %v2051_v4 = vsel %vm326_vm13, %v762_v59, %v1659_v17  ;;  %v2055_v16 = vsel %vm326_vm13, %v764_v15, %v1683_v44 }
 0x177   : > { %v864_v18 = vmul.f32 %v1883_v35, %v2051_v4  ;;  %v865_v51 = vmul.f32 %v1875_v28, %v2055_v16 }
 0x179   : > { %885 = vrot.lane.b32.xlu1 %v864_v18, %s1289_s17  ;;  %v766_v22 = vpop.permute.xlu1 %765  ;;  %887 = vrot.lane.b32.xlu0 %v865_v51, %s1289_s17  ;;  %v622_v44 = vpop.permute.xlu0 %621 }
 0x17a   : > { %v2065_v21 = vsel %vm326_vm13, %v766_v22, %v1685_v49 }
 0x17b   : > { %v866_v17 = vmul.f32 %v1883_v35, %v2065_v21 }
 0x17d   : > { %889 = vrot.lane.b32.xlu1 %v866_v17, %s1289_s17  ;;  %v624_v54 = vpop.permute.xlu1 %623  ;;  %v626_v27 = vpop.permute.xlu0 %625 }
 0x181   : > { %v2070_v23 = vpop.permute.xlu1 %627  ;;  %v2072_v28 = vpop.permute.xlu0 %629 }
 0x185   : > { %v2074_v31 = vpop.permute.xlu1 %631  ;;  %v2076_v8 = vpop.permute.xlu0 %777 }
 0x186   : > { %v783_v22 = vmul.f32 %v2076_v8, %v2013_v47 }
 0x189   : > { %v2078_v26 = vpop.permute.xlu1 %779  ;;  %v2080_v49 = vpop.permute.xlu0 %817 }
 0x18d   : > { %v2082_v61 = vpop.permute.xlu1 %819  ;;  %v2084_v35 = vpop.permute.xlu0 %821 }
 0x191   : > { %v2086_v29 = vpop.permute.xlu1 %823  ;;  %v2088_v1 = vpop.permute.xlu0 %825 }
 0x195   : > { %v2090_v10 = vpop.permute.xlu1 %827  ;;  %v2092_v11 = vpop.permute.xlu0 %829 }
 0x199   : > { %v2094_v13 = vpop.permute.xlu1 %831 }
 0x1bf   : > { %v476_v38 = vpop.permute.xlu0 %475 }
 0x1c0   : > { %v499_v52 = vadd.f32 %v476_v38, %v1910_v46 }
 0x1c2   : > { %v591_v60 = vadd.f32 %v1958_v20, %v499_v52 }
 0x1c3   : > { %v478_v33 = vpop.permute.xlu1 %477  ;;  %v480_v37 = vpop.permute.xlu0 %479 }
 0x1c4   : > { %v500_v40 = vadd.f32 %v478_v33, %v1921_v0  ;;  %v501_v12 = vadd.f32 %v480_v37, %v1923_v62  ;;  %v588_v0 = vmul.f32 %v1900_v36, %v1995_v30  ;;  %v641_v24 = vadd.f32 %v1902_v41, %v591_v60 }
 0x1c5   : > { %v784_v41 = vmul.f32 %v2078_v26, %v2023_v48 }
 0x1c6   : > { %v592_v14 = vadd.f32 %v584_v32, %v500_v40  ;;  %v593_v5 = vadd.f32 %v1974_v55, %v501_v12  ;;  %v787_v12 = vmul.f32 %v2076_v8, %v2041_v3 }
 0x1c7   : > { %v482_v25 = vpop.permute.xlu1 %481  ;;  %v484_v6 = vpop.permute.xlu0 %483 }
 0x1c8   : > { %v502_v46 = vadd.f32 %v482_v25, %v1934_v45  ;;  %v503_v20 = vadd.f32 %v484_v6, %v1936_v63  ;;  %v590_v63 = vmul.f32 %v1900_v36, %v2009_v39  ;;  %v643_v38 = vadd.f32 %v622_v44, %v593_v5 }
 0x1c9   : > { %v785_v36 = vmul.f32 %v2076_v8, %v2027_v57 }
 0x1ca   : > { %v594_v42 = vadd.f32 %v586_v7, %v502_v46  ;;  %v595_v34 = vadd.f32 %v1988_v2, %v503_v20 }
 0x1cb   : > { %v486_v19 = vpop.permute.xlu1 %485  ;;  %v488_v59 = vpop.permute.xlu0 %487 }
 0x1cc   : > { %v504_v62 = vadd.f32 %v486_v19, %v1947_v43  ;;  %v505_v55 = vadd.f32 %v488_v59, %v1949_v56  ;;  %v642_v56 = vadd.f32 %v1904_v50, %v592_v14  ;;  %v644_v37 = vadd.f32 %v624_v54, %v594_v42 }
 0x1cd   : > { %v645_v47 = vadd.f32 %v626_v27, %v595_v34  ;;  %v786_v50 = vmul.f32 %v2078_v26, %v2037_v58  ;;  %v788_v54 = vmul.f32 %v2078_v26, %v2051_v4  ;;  %v789_v58 = vmul.f32 %v2076_v8, %v2055_v16 }
 0x1ce   : > { %v596_v15 = vadd.f32 %v588_v0, %v504_v62  ;;  %v597_v18 = vadd.f32 %v2002_v53, %v505_v55 }
 0x1cf   : > { %v490_v45 = vpop.permute.xlu1 %489  ;;  %v676_v51 = vpop.permute.xlu0 %675 }
 0x1d0   : > { %v506_v2 = vadd.f32 %v490_v45, %v1963_v9  ;;  %v699_v30 = vadd.f32 %v676_v51, %v641_v24  ;;  %v646_v25 = vadd.f32 %v2070_v23, %v596_v15  ;;  %v647_v57 = vadd.f32 %v2072_v28, %v597_v18 }
 0x1d1   : > { %v790_v28 = vmul.f32 %v2078_v26, %v2065_v21 }
 0x1d2   : > { %v598_v17 = vadd.f32 %v590_v63, %v506_v2  ;;  %v791_v43 = vadd.f32 %v783_v22, %v699_v30 }
 0x1d3   : > { %v678_v52 = vpop.permute.xlu1 %677  ;;  %v680_v53 = vpop.permute.xlu0 %679 }
 0x1d4   : > { %v700_v60 = vadd.f32 %v678_v52, %v642_v56  ;;  %v701_v39 = vadd.f32 %v680_v53, %v643_v38  ;;  %v648_v3 = vadd.f32 %v2074_v31, %v598_v17  ;;  %v841_v34 = vadd.f32 %v2080_v49, %v791_v43 }
 0x1d6   : > { %v792_v9 = vadd.f32 %v784_v41, %v700_v60  ;;  %v793_v33 = vadd.f32 %v785_v36, %v701_v39 }
 0x1d7   : > { %v682_v32 = vpop.permute.xlu1 %681  ;;  %v684_v40 = vpop.permute.xlu0 %683 }
 0x1d8   : > { %v702_v44 = vadd.f32 %v682_v32, %v644_v37  ;;  %v703_v14 = vadd.f32 %v684_v40, %v645_v47  ;;  %v842_v4 = vadd.f32 %v2082_v61, %v792_v9  ;;  %v843_v16 = vadd.f32 %v2084_v35, %v793_v33 }
 0x1da   : > { %v794_v48 = vadd.f32 %v786_v50, %v702_v44  ;;  %v795_v5 = vadd.f32 %v787_v12, %v703_v14 }
 0x1db   : > { %v686_v6 = vpop.permute.xlu1 %685  ;;  %v688_v7 = vpop.permute.xlu0 %687 }
 0x1dc   : > { %v704_v27 = vadd.f32 %v686_v6, %v646_v25  ;;  %v705_v46 = vadd.f32 %v688_v7, %v647_v57  ;;  %v844_v49 = vadd.f32 %v2086_v29, %v794_v48  ;;  %v845_v18 = vadd.f32 %v2088_v1, %v795_v5 }
 0x1de   : > { %v796_v20 = vadd.f32 %v788_v54, %v704_v27  ;;  %v797_v42 = vadd.f32 %v789_v58, %v705_v46 }
 0x1df   : > { %v690_v19 = vpop.permute.xlu1 %689  ;;  %v876_v23 = vpop.permute.xlu0 %875 }
 0x1e0   : > { %v706_v59 = vadd.f32 %v690_v19, %v648_v3  ;;  %v899_v0 = vadd.f32 %v876_v23, %v841_v34  ;;  %v846_v61 = vadd.f32 %v2090_v10, %v796_v20  ;;  %v847_v35 = vadd.f32 %v2092_v11, %v797_v42 }
 0x1e2   : > { %v798_v62 = vadd.f32 %v790_v28, %v706_v59  ;;  %915 = vrot.lane.b32.xlu0 %v899_v0, %s1290_s28 }
 0x1e3   : > { %v878_v8 = vpop.permute.xlu1 %877  ;;  %v880_v55 = vpop.permute.xlu0 %879 }
 0x1e4   : > { %v900_v15 = vadd.f32 %v878_v8, %v842_v4  ;;  %v901_v31 = vadd.f32 %v880_v55, %v843_v16  ;;  %v848_v29 = vadd.f32 %v2094_v13, %v798_v62 }
 0x1e6   : > { %917 = vrot.lane.b32.xlu1 %v900_v15, %s1290_s28  ;;  %919 = vrot.lane.b32.xlu0 %v901_v31, %s1290_s28 }
 0x1e7   : > { %v882_v21 = vpop.permute.xlu1 %881  ;;  %v884_v26 = vpop.permute.xlu0 %883 }
 0x1e8   : > { %v902_v24 = vadd.f32 %v882_v21, %v844_v49  ;;  %v903_v45 = vadd.f32 %v884_v26, %v845_v18 }
 0x1ea   : > { %921 = vrot.lane.b32.xlu1 %v902_v24, %s1290_s28  ;;  %923 = vrot.lane.b32.xlu0 %v903_v45, %s1290_s28 }
 0x1eb   : > { %v886_v51 = vpop.permute.xlu1 %885  ;;  %v888_v63 = vpop.permute.xlu0 %887 }
 0x1ec   : > { %v904_v2 = vadd.f32 %v886_v51, %v846_v61  ;;  %v905_v22 = vadd.f32 %v888_v63, %v847_v35 }
 0x1ee   : > { %925 = vrot.lane.b32.xlu1 %v904_v2, %s1290_s28  ;;  %927 = vrot.lane.b32.xlu0 %v905_v22, %s1290_s28 }
 0x1ef   : > { %v890_v1 = vpop.permute.xlu1 %889 }
 0x1f0   : > { %v906_v30 = vadd.f32 %v890_v1, %v848_v29 }
 0x1f2   : > { %929 = vrot.lane.b32.xlu1 %v906_v30, %s1290_s28 }
 0x254   : > { %v916_v17 = vpop.permute.xlu0 %915 }
 0x255   : > { %939 = vst.msk [vmem:[%s201_s24] sm:$0xff] %vm202_vm0, %v916_v17 }
 0x258   : > { %v918_v10 = vpop.permute.xlu1 %917  ;;  %v920_v43 = vpop.permute.xlu0 %919 }
 0x259   : > { %940 = vst.msk [vmem:[%s201_s24 + $0x8] sm:$0xff] %vm202_vm0, %v918_v10  ;;  %941 = vst.msk [vmem:[%s201_s24 + $0x10] sm:$0xff] %vm202_vm0, %v920_v43 }
 0x25c   : > { %v922_v11 = vpop.permute.xlu1 %921  ;;  %v924_v56 = vpop.permute.xlu0 %923 }
 0x25d   : > { %942 = vst.msk [vmem:[%s201_s24 + $0x18] sm:$0xff] %vm202_vm0, %v922_v11  ;;  %943 = vst.msk [vmem:[%s201_s24 + $0x20] sm:$0xff] %vm202_vm0, %v924_v56 }
 0x260   : > { %v926_v13 = vpop.permute.xlu1 %925  ;;  %v928_v38 = vpop.permute.xlu0 %927 }
 0x261   : > { %944 = vst.msk [vmem:[%s201_s24 + $0x28] sm:$0xff] %vm202_vm0, %v926_v13  ;;  %945 = vst.msk [vmem:[%s201_s24 + $0x30] sm:$0xff] %vm202_vm0, %v928_v38 }
 0x264   : > { %v930_v52 = vpop.permute.xlu1 %929 }
 0x265   : > { %946 = vst.msk [vmem:[%s201_s24 + $0x38] sm:$0xff] %vm202_vm0, %v930_v52 }
 0x266   : > { %1222 = shalt.err (!%p1219_p11)
}
 0x267   : > { %s1223_s23 = scalar_lea.hbm %s2160_s14, 1024  ;;  %s1227_s20 = scalar_lea.hbm %s2207_s2, 2048 }
 0x268   : > { %p1224_p3 = scmp.ne.s32.totalorder %s2160_s14, %s1223_s23  ;;  %p1228_p2 = scmp.lt.u32.totalorder %s2160_s14, %s2207_s2 }
 0x269   : > { %p1229_p4 = scmp.lt.u32.totalorder %s1227_s20, %s1223_s23  ;;  %p1231_p13 = scmp.lt.u32.totalorder %s1223_s23, %s2160_s14 }
 0x26a   : > { %p1225_p8 = pnand %p1224_p3, %p2219_p1 }
 0x26b   : > { %p1230_p6 = por %p1229_p4, %p1228_p2 }
 0x26c   : > { %p1226_p0 = pneg %p1225_p8 }
 0x26d   : > { %p1232_p12 = por %p1231_p13, %p1230_p6 }
 0x26f   : > { %p1233_p10 = pnand %p1232_p12, %p1226_p0 }
 0x271   : > { %1236 = shalt.err (!%p1233_p10)
}
 0x272   : > { %s1292_s17 = smov 128   ;;  %s1293_s28 = smov 8  }
 0x273   : > { %1092 = dma.vmem_to_hbm [thread:$0]  (%p2219_p1), %s2153_s25, 1024, %s2160_s14, %s948_s13, %s1292_s17, %s1292_s17, %s1293_s28  }
 0x274 PF: > { %s976_s24 = sand.u32 1, %s1267_s9   ;;  %p2220_p5 = scmp.ne.s32.totalorder %s2213_s22, 0 }
 0x275   : > { %p2221_p7 = scmp.ge.s32.totalorder %s1279_s12, 2  ;;  %s977_s29 = scalar_lea.sflag [#allocation5], %s976_s24 }
 0x277   : > { %p1102_p9 = pnand %p2221_p7, %p2220_p5 }
 0x279   : > { %1262 = dma.done.wait (!%p1102_p9), %s977_s29, 1024  }
 0x27a   : > { %1264 = vsyncadd (!%p1102_p9), %s977_s29, 4294966272  ;;  %p18_p11 = scmp.ge.s32.totalorder %s1334_s15, 4   ;;  %s2222_s9 = smov %s1271_s10 }
 0x27b   : > { %s2223_s10 = smov %s1275_s11  ;;  %s2224_s11 = smov %s1346_s18 }
 0x27c   : > { %s2225_s12 = smov %s1334_s15  ;;  %20 = sbr.rel (!%p18_p11) target bundleno = 7 (0x7), region = 87 }
 0x283   :  { %982 = vsyncpa [#allocation4], 1 }
 0x284   :  { %984 = vsyncpa [#allocation4 + $0x1], 1 }
 0x285   :  { %985 = vsyncpa [#allocation7], 1 }
 0x286   :  { %987 = vsyncpa [#allocation7 + $0x1], 1 }
 0x287   :  { %988 = vsyncpa [#allocation5], 1 }
 0x288   :  { %990 = vsyncpa [#allocation5 + $0x1], 1 }

</bundles_post_ra>
